<compile_context>
chip_gen: v7x
topology: tpu7x:2x2x1
jax: 0.10.0
libtpu: 0.0.40
codegen_flags: <defaults>
</compile_context>

<pallas_src>
import jax
import jax.numpy as jnp
from jax.experimental import pallas as pl
from jax.experimental.pallas import tpu as pltpu

H1 = 512   # first hidden width
H2 = 256   # second hidden width

_VMEM_TARGET = 40 * 1024 * 1024    # planning budget, safe under v7x 64 MiB VMEM
_SMALL_RESIDENT = 1 * 1024 * 1024  # w2 (bf16, dbl-buf) + biases + w3 + out + slack


def _leaky_relu(x, slope=0.2):
    return jnp.where(x > 0, x, slope * x)


def _round_up(x, m):
    return ((x + m - 1) // m) * m


def discriminator_kernel(x_ref, w1_ref, b1_ref, w2_ref, b2_ref, w3_ref, b3_ref,
                         out_ref, acc_ref):
    k = pl.program_id(1)

    @pl.when(k == 0)
    def _():
        acc_ref[...] = jnp.zeros_like(acc_ref)

    # First layer (K-tiled when D is huge, single step otherwise): the f32 x
    # tile is cast to bf16 here (VPU, overlapped with MXU), f32 accumulation.
    acc_ref[...] += jnp.dot(x_ref[...].astype(jnp.bfloat16), w1_ref[...],
                            preferred_element_type=jnp.float32)

    @pl.when(k == pl.num_programs(1) - 1)
    def _():
        h1 = _leaky_relu(acc_ref[...] + b1_ref[...])            # f32 (tm, 512)
        h2 = jnp.dot(h1.astype(jnp.bfloat16), w2_ref[...],
                     preferred_element_type=jnp.float32)
        h2 = _leaky_relu(h2 + b2_ref[...])                      # f32 (tm, 256)
        # 256 -> 1: lane-wise multiply + cross-lane reduce (VPU/XLU, not MXU).
        h3 = jnp.sum(h2 * w3_ref[...], axis=-1, keepdims=True) + b3_ref[...]
        # Exact sigmoid (exp on EUP, exact divide); negligible cost at (tm, 1).
        out_ref[...] = 1.0 / (1.0 + jnp.exp(-h3))


def _choose_tiles(b, d_pad):
    """Pick (tm, b_pad, tk).

    Feature axis: w1 fully resident (tk == d_pad, n_kt == 1) whenever the
    double-buffered bf16 w1 slab + a minimal x tile fit the planning budget;
    otherwise the largest power-of-two K tile (<= 2048) dividing d_pad.
    Batch axis: biggest tile the remaining budget allows (amortizes grid-step
    overhead and, when K-tiled, minimizes w1 re-streaming), but >= 2 tiles for
    b > 16 so the "parallel" axis can shard across v7x's two TensorCores.
    """
    w1_resident_bytes = 2 * d_pad * H1 * 2         # double-buffered bf16 w1
    min_x_tile_bytes = 2 * 8 * d_pad * 4           # tm == 8, double-buffered f32
    if w1_resident_bytes + min_x_tile_bytes + _SMALL_RESIDENT <= _VMEM_TARGET:
        tk = d_pad                                  # n_kt == 1 -> w1 DMA'd once
    else:
        tk = next(c for c in (2048, 1024, 512, 256, 128) if d_pad % c == 0)

    x_budget = _VMEM_TARGET - 2 * tk * H1 * 2 - _SMALL_RESIDENT
    per_row = 2 * tk * 4 + H1 * 4                   # x (f32, dbl-buf) + f32 acc
    cap = max(8, min(512, (x_budget // per_row) // 8 * 8))

    b8 = _round_up(b, 8)
    if b8 <= 16:
        tm = min(b8, cap)                           # tiny batch: no useful split
    else:
        tm = min(cap, _round_up((b8 + 1) // 2, 8))  # >= 2 batch tiles
    b_pad = _round_up(b, tm)
    return tm, b_pad, tk


def prepare_params(params):
    """One-time conversion (hoisted out of the per-call forward): pad w1 rows
    to a multiple of 128 and cast the large weights to bf16."""
    w1, b1, w2, b2, w3, b3 = params
    d = w1.shape[0]
    d_pad = _round_up(d, 128)
    w1_p = jnp.pad(w1, ((0, d_pad - d), (0, 0))).astype(jnp.bfloat16)
    w2_b = jnp.asarray(w2, jnp.float32).astype(jnp.bfloat16)
    b1_f = jnp.asarray(b1, jnp.float32).reshape(1, H1)
    b2_f = jnp.asarray(b2, jnp.float32).reshape(1, H2)
    w3_r = jnp.asarray(w3, jnp.float32).reshape(1, H2)   # (1, 256) VPU reduce row
    b3_f = jnp.asarray(b3, jnp.float32).reshape(1, 1)
    return (w1_p, b1_f, w2_b, b2_f, w3_r, b3_f)


def discriminator_forward(img, prepared_params):
    """img: (B, C, H, W) float32 NCHW.  prepared_params: from prepare_params().
    Returns validity (B, 1) float32 (bf16 matmul operands, f32 accumulation)."""
    w1_p, b1_f, w2_b, b2_f, w3_r, b3_f = prepared_params
    b = img.shape[0]
    x = img.reshape(b, -1).astype(jnp.float32)   # row-major flatten == torch .view
    d = x.shape[1]
    d_pad = w1_p.shape[0]
    assert d <= d_pad and d_pad % 128 == 0, (d, d_pad)

    tm, b_pad, tk = _choose_tiles(b, d_pad)
    n_bt, n_kt = b_pad // tm, d_pad // tk

    # x stays f32 here (cast to bf16 inside the kernel); zero-padded rows/cols
    # contribute zero to the accumulation.
    x_p = jnp.pad(x, ((0, b_pad - b), (0, d_pad - d)))

    # Explicit VMEM budget (double-buffer accounting for every operand).
    est = (2 * tm * tk * 4           # x tiles (f32, double-buffered)
           + 2 * tk * H1 * 2         # w1 tiles (bf16, double-buffered)
           + tm * H1 * 4             # f32 accumulator scratch
           + _SMALL_RESIDENT)        # w2 + biases + w3 row + output + slack
    vmem_limit = int(min(max(est * 3 // 2, 16 * 1024 * 1024), 48 * 1024 * 1024))

    grid_spec = pltpu.PrefetchScalarGridSpec(
        num_scalar_prefetch=0,
        grid=(n_bt, n_kt),
        in_specs=[
            pl.BlockSpec((tm, tk), lambda i, k: (i, k)),    # x tile (f32)
            # Constant block index when n_kt == 1 -> w1 fetched once per call.
            pl.BlockSpec((tk, H1), lambda i, k: (k, 0)),    # w1 tile (bf16)
            pl.BlockSpec((1, H1), lambda i, k: (0, 0)),     # b1 (resident)
            pl.BlockSpec((H1, H2), lambda i, k: (0, 0)),    # w2 (resident, bf16)
            pl.BlockSpec((1, H2), lambda i, k: (0, 0)),     # b2 (resident)
            pl.BlockSpec((1, H2), lambda i, k: (0, 0)),     # w3 row (resident)
            pl.BlockSpec((1, 1), lambda i, k: (0, 0)),      # b3 (resident)
        ],
        out_specs=pl.BlockSpec((tm, 1), lambda i, k: (i, 0)),
        scratch_shapes=[pltpu.VMEM((tm, H1), jnp.float32)],
    )

    out_pad = pl.pallas_call(
        discriminator_kernel,
        out_shape=jax.ShapeDtypeStruct((b_pad, 1), jnp.float32),
        grid_spec=grid_spec,
        compiler_params=pltpu.CompilerParams(
            dimension_semantics=("parallel", "arbitrary"),
            vmem_limit_bytes=vmem_limit,
        ),
    )(x_p, w1_p, b1_f, w2_b, b2_f, w3_r, b3_f)

    return out_pad[:b]


def init_params(key, in_features):
    """Deterministic synthetic init (PyTorch-Linear-like uniform fan-in)."""
    dims = [(in_features, H1), (H1, H2), (H2, 1)]
    params = []
    for i, (fan_in, fan_out) in enumerate(dims):
        kw, kb = jax.random.split(jax.random.fold_in(key, i))
        bound = 1.0 / (fan_in ** 0.5)
        w = jax.random.uniform(kw, (fan_in, fan_out), jnp.float32, -bound, bound)
        bvec = jax.random.uniform(kb, (1, fan_out), jnp.float32, -bound, bound)
        params += [w, bvec]
    return tuple(params)


def reference_forward(img, params):
    """Pure-JAX f32 reference for a sanity check."""
    x = img.reshape(img.shape[0], -1)
    w1, b1, w2, b2, w3, b3 = params
    h1 = x @ w1 + b1
    h1 = jnp.where(h1 > 0, h1, 0.2 * h1)
    h2 = h1 @ w2 + b2
    h2 = jnp.where(h2 > 0, h2, 0.2 * h2)
    return jax.nn.sigmoid(h2 @ w3 + b3)


if __name__ == "__main__":
    key = jax.random.PRNGKey(0)
    k_img, k_par = jax.random.split(key)

    B, C, H, W = 2, 4, 16, 16          # img_shape = (4, 16, 16), batch 2
    img = jax.random.normal(k_img, (B, C, H, W), jnp.float32)
    raw_params = init_params(k_par, C * H * W)
    params = prepare_params(raw_params)    # one-time weight pad/cast (hoisted)

    fwd = jax.jit(discriminator_forward)
    out = jax.block_until_ready(fwd(img, params))
    ref = reference_forward(img, raw_params)

    assert out.shape == (B, 1), out.shape
    # bf16 matmul operands (f32 accumulation) => loosened tolerance vs f32 ref.
    assert jnp.allclose(out, ref, atol=2e-2, rtol=2e-2), (out, ref)

    print("KERNEL_OK")
</pallas_src>

<mosaic_0001>
module attributes {stable_mosaic.version = 11 : i64} {
  func.func @discriminator_kernel(%arg0: i32, %arg1: i32, %arg2: memref<8x1024xf32, #tpu.memory_space<vmem>>, %arg3: memref<1024x512xbf16, #tpu.memory_space<vmem>>, %arg4: memref<1x512xf32, #tpu.memory_space<vmem>>, %arg5: memref<512x256xbf16, #tpu.memory_space<vmem>>, %arg6: memref<1x256xf32, #tpu.memory_space<vmem>>, %arg7: memref<1x256xf32, #tpu.memory_space<vmem>>, %arg8: memref<1x1xf32, #tpu.memory_space<vmem>>, %arg9: memref<8x1xf32, #tpu.memory_space<vmem>>, %arg10: memref<8x512xf32, #tpu.memory_space<vmem>>) attributes {dimension_semantics = [#tpu.dimension_semantics<parallel>, #tpu.dimension_semantics<arbitrary>], iteration_bounds = array<i64: 1, 1>, scalar_prefetch = 0 : i64, scratch_operands = 1 : i64, tpu.core_type = #tpu.core_type<tc>, window_params = [{transform_indices = @transform_0, window_bounds = array<i64: 8, 1024>}, {transform_indices = @transform_1, window_bounds = array<i64: 1024, 512>}, {pipeline_mode = #tpu.pipeline_mode<synchronous>, transform_indices = @transform_2, window_bounds = array<i64: 1, 512>}, {pipeline_mode = #tpu.pipeline_mode<synchronous>, transform_indices = @transform_3, window_bounds = array<i64: 512, 256>}, {pipeline_mode = #tpu.pipeline_mode<synchronous>, transform_indices = @transform_4, window_bounds = array<i64: 1, 256>}, {pipeline_mode = #tpu.pipeline_mode<synchronous>, transform_indices = @transform_5, window_bounds = array<i64: 1, 256>}, {pipeline_mode = #tpu.pipeline_mode<synchronous>, transform_indices = @transform_6, window_bounds = array<i64: 1, 1>}, {transform_indices = @transform_7, window_bounds = array<i64: 8, 1>}]} {
    %c0_i32 = arith.constant 0 : i32
    %0 = arith.cmpi eq, %arg1, %c0_i32 : i32
    %1 = arith.extui %0 : i1 to i32
    %c0_i32_0 = arith.constant 0 : i32
    %2 = arith.cmpi ne, %1, %c0_i32_0 : i32
    scf.if %2 {
      %cst_10 = arith.constant 0.000000e+00 : f32
      %13 = vector.broadcast %cst_10 : f32 to vector<8x512xf32>
      %c0_11 = arith.constant 0 : index
      %c0_12 = arith.constant 0 : index
      %14 = vector.load %arg10[%c0_11, %c0_12] : memref<8x512xf32, #tpu.memory_space<vmem>>, vector<8x512xf32>
      tpu.vector_store %arg10[%c0_11, %c0_12], %13 {strides = array<i32>} : memref<8x512xf32, #tpu.memory_space<vmem>>, vector<8x512xf32>,
    } else {
    }
    %c0 = arith.constant 0 : index
    %c0_1 = arith.constant 0 : index
    %3 = vector.load %arg10[%c0, %c0_1] : memref<8x512xf32, #tpu.memory_space<vmem>>, vector<8x512xf32>
    %c0_2 = arith.constant 0 : index
    %c0_3 = arith.constant 0 : index
    %4 = vector.load %arg2[%c0_2, %c0_3] : memref<8x1024xf32, #tpu.memory_space<vmem>>, vector<8x1024xf32>
    %5 = arith.truncf %4 : vector<8x1024xf32> to vector<8x1024xbf16>
    %c0_4 = arith.constant 0 : index
    %c0_5 = arith.constant 0 : index
    %6 = vector.load %arg3[%c0_4, %c0_5] : memref<1024x512xbf16, #tpu.memory_space<vmem>>, vector<1024x512xbf16>
    %cst = arith.constant dense<0.000000e+00> : vector<8x512xf32>
    %7 = tpu.matmul %5, %6, %cst {dimension_numbers = #tpu.dot_dimension_numbers<[1], [0], [0], [1], [0, 0, 1, 1], [], []>} : vector<8x1024xbf16>, vector<1024x512xbf16>, vector<8x512xf32> -> vector<8x512xf32>
    %8 = arith.addf %3, %7 : vector<8x512xf32>
    %c0_6 = arith.constant 0 : index
    %c0_7 = arith.constant 0 : index
    %9 = vector.load %arg10[%c0_6, %c0_7] : memref<8x512xf32, #tpu.memory_space<vmem>>, vector<8x512xf32>
    tpu.vector_store %arg10[%c0_6, %c0_7], %8 {strides = array<i32>} : memref<8x512xf32, #tpu.memory_space<vmem>>, vector<8x512xf32>,
    %c0_i32_8 = arith.constant 0 : i32
    %10 = arith.cmpi eq, %arg1, %c0_i32_8 : i32
    %11 = arith.extui %10 : i1 to i32
    %c0_i32_9 = arith.constant 0 : i32
    %12 = arith.cmpi ne, %11, %c0_i32_9 : i32
    scf.if %12 {
      %c0_10 = arith.constant 0 : index
      %c0_11 = arith.constant 0 : index
      %13 = vector.load %arg10[%c0_10, %c0_11] : memref<8x512xf32, #tpu.memory_space<vmem>>, vector<8x512xf32>
      %c0_12 = arith.constant 0 : index
      %c0_13 = arith.constant 0 : index
      %14 = vector.load %arg4[%c0_12, %c0_13] : memref<1x512xf32, #tpu.memory_space<vmem>>, vector<1x512xf32>
      %15 = vector.broadcast %14 : vector<1x512xf32> to vector<8x512xf32>
      %16 = arith.addf %13, %15 : vector<8x512xf32>
      %cst_14 = arith.constant 0.000000e+00 : f32
      %17 = vector.broadcast %cst_14 : f32 to vector<8x512xf32>
      %18 = arith.cmpf ogt, %16, %17 : vector<8x512xf32>
      %cst_15 = arith.constant 2.000000e-01 : f32
      %19 = vector.broadcast %cst_15 : f32 to vector<8x512xf32>
      %20 = arith.mulf %19, %16 : vector<8x512xf32>
      %21 = arith.select %18, %16, %20 : vector<8x512xi1>, vector<8x512xf32>
      %22 = arith.truncf %21 : vector<8x512xf32> to vector<8x512xbf16>
      %c0_16 = arith.constant 0 : index
      %c0_17 = arith.constant 0 : index
      %23 = vector.load %arg5[%c0_16, %c0_17] : memref<512x256xbf16, #tpu.memory_space<vmem>>, vector<512x256xbf16>
      %cst_18 = arith.constant dense<0.000000e+00> : vector<8x256xf32>
      %24 = tpu.matmul %22, %23, %cst_18 {dimension_numbers = #tpu.dot_dimension_numbers<[1], [0], [0], [1], [0, 0, 1, 1], [], []>} : vector<8x512xbf16>, vector<512x256xbf16>, vector<8x256xf32> -> vector<8x256xf32>
      %c0_19 = arith.constant 0 : index
      %c0_20 = arith.constant 0 : index
      %25 = vector.load %arg6[%c0_19, %c0_20] : memref<1x256xf32, #tpu.memory_space<vmem>>, vector<1x256xf32>
      %26 = vector.broadcast %25 : vector<1x256xf32> to vector<8x256xf32>
      %27 = arith.addf %24, %26 : vector<8x256xf32>
      %cst_21 = arith.constant 0.000000e+00 : f32
      %28 = vector.broadcast %cst_21 : f32 to vector<8x256xf32>
      %29 = arith.cmpf ogt, %27, %28 : vector<8x256xf32>
      %cst_22 = arith.constant 2.000000e-01 : f32
      %30 = vector.broadcast %cst_22 : f32 to vector<8x256xf32>
      %31 = arith.mulf %30, %27 : vector<8x256xf32>
      %32 = arith.select %29, %27, %31 : vector<8x256xi1>, vector<8x256xf32>
      %c0_23 = arith.constant 0 : index
      %c0_24 = arith.constant 0 : index
      %33 = vector.load %arg7[%c0_23, %c0_24] : memref<1x256xf32, #tpu.memory_space<vmem>>, vector<1x256xf32>
      %34 = vector.broadcast %33 : vector<1x256xf32> to vector<8x256xf32>
      %35 = arith.mulf %32, %34 : vector<8x256xf32>
      %cst_25 = arith.constant dense<0.000000e+00> : vector<8xf32>
      %36 = vector.multi_reduction <add>, %35, %cst_25 [1] : vector<8x256xf32> to vector<8xf32>
      %37 = vector.shape_cast %36 : vector<8xf32> to vector<8x1xf32>
      %c0_26 = arith.constant 0 : index
      %c0_27 = arith.constant 0 : index
      %38 = vector.load %arg8[%c0_26, %c0_27] : memref<1x1xf32, #tpu.memory_space<vmem>>, vector<1x1xf32>
      %39 = vector.broadcast %38 : vector<1x1xf32> to vector<8x1xf32>
      %40 = arith.addf %37, %39 : vector<8x1xf32>
      %cst_28 = arith.constant 0.000000e+00 : f32
      %41 = vector.broadcast %cst_28 : f32 to vector<8x1xf32>
      %42 = arith.subf %41, %40 : vector<8x1xf32>
      %43 = math.exp %42 : vector<8x1xf32>
      %cst_29 = arith.constant 1.000000e+00 : f32
      %44 = vector.broadcast %cst_29 : f32 to vector<8x1xf32>
      %45 = arith.addf %44, %43 : vector<8x1xf32>
      %cst_30 = arith.constant 1.000000e+00 : f32
      %46 = vector.broadcast %cst_30 : f32 to vector<8x1xf32>
      %47 = arith.divf %46, %45 : vector<8x1xf32>
      %c0_31 = arith.constant 0 : index
      %c0_32 = arith.constant 0 : index
      %48 = vector.load %arg9[%c0_31, %c0_32] : memref<8x1xf32, #tpu.memory_space<vmem>>, vector<8x1xf32>
      tpu.vector_store %arg9[%c0_31, %c0_32], %47 {strides = array<i32>} : memref<8x1xf32, #tpu.memory_space<vmem>>, vector<8x1xf32>,
    } else {
    }
    return
  }
  func.func @transform_0(%arg0: i32, %arg1: i32) -> (i32, i32) {
    %c0_i32 = arith.constant 0 : i32
    return %arg0, %arg1 : i32, i32
  }
  func.func @transform_1(%arg0: i32, %arg1: i32) -> (i32, i32) {
    %c0_i32 = arith.constant 0 : i32
    %c0_i32_0 = arith.constant 0 : i32
    return %arg1, %c0_i32 : i32, i32
  }
  func.func @transform_2(%arg0: i32, %arg1: i32) -> (i32, i32) {
    %c0_i32 = arith.constant 0 : i32
    %c0_i32_0 = arith.constant 0 : i32
    %c0_i32_1 = arith.constant 0 : i32
    return %c0_i32, %c0_i32_0 : i32, i32
  }
  func.func @transform_3(%arg0: i32, %arg1: i32) -> (i32, i32) {
    %c0_i32 = arith.constant 0 : i32
    %c0_i32_0 = arith.constant 0 : i32
    %c0_i32_1 = arith.constant 0 : i32
    return %c0_i32, %c0_i32_0 : i32, i32
  }
  func.func @transform_4(%arg0: i32, %arg1: i32) -> (i32, i32) {
    %c0_i32 = arith.constant 0 : i32
    %c0_i32_0 = arith.constant 0 : i32
    %c0_i32_1 = arith.constant 0 : i32
    return %c0_i32, %c0_i32_0 : i32, i32
  }
  func.func @transform_5(%arg0: i32, %arg1: i32) -> (i32, i32) {
    %c0_i32 = arith.constant 0 : i32
    %c0_i32_0 = arith.constant 0 : i32
    %c0_i32_1 = arith.constant 0 : i32
    return %c0_i32, %c0_i32_0 : i32, i32
  }
  func.func @transform_6(%arg0: i32, %arg1: i32) -> (i32, i32) {
    %c0_i32 = arith.constant 0 : i32
    %c0_i32_0 = arith.constant 0 : i32
    %c0_i32_1 = arith.constant 0 : i32
    return %c0_i32, %c0_i32_0 : i32, i32
  }
  func.func @transform_7(%arg0: i32, %arg1: i32) -> (i32, i32) {
    %c0_i32 = arith.constant 0 : i32
    %c0_i32_0 = arith.constant 0 : i32
    return %arg0, %c0_i32 : i32, i32
  }
}

</mosaic_0001>

<bundles_post_ra>
// kernel: discriminator_forward.1
= control target key start
LH: loop header
LB: loop body
LE: loop exit
PB: predicated region body
PF: predicated region fallthrough
CT: control target
= control target key end

     0   :  { %s3562_s0 = inlined_call_operand.vmem [shape: f32[8,1024], index: 0, kind: input, shape index: {}]   ;;  %s3563_s1 = inlined_call_operand.hbm [shape: bf16[1024,512], index: 1, kind: input, shape index: {}]   ;;  %s3564_s2 = inlined_call_operand.vmem [shape: f32[1,512], index: 2, kind: input, shape index: {}]   ;;  %s3565_s3 = inlined_call_operand.hbm [shape: bf16[512,256], index: 3, kind: input, shape index: {}]   ;;  %s3566_s4 = inlined_call_operand.vmem [shape: f32[1,256], index: 4, kind: input, shape index: {}]   ;;  %s3567_s5 = inlined_call_operand.vmem [shape: f32[1,256], index: 5, kind: input, shape index: {}]   ;;  %s3568_s6 = inlined_call_operand.<no memory space> [shape: f32[1,1], index: 6, kind: input, shape index: {}]   ;;  %s3569_s7 = inlined_call_operand.vmem [shape: f32[8,1], index: 7, kind: output, shape index: {}]  }
   0x1   :  { %v12_v0 = vstv %s3568_s6 }
   0x2   :  { %13 = vst [vmem:[#allocation3] sm:$0x1] %v12_v0 }
   0x3   :  { %14 = vsyncpa [#allocation5], 0 }
   0x4   :  { %15 = vsyncpa [#allocation7], 0  ;;  %s3393_s26 = smov [#allocation4]   ;;  %s3345_s30 = scalar_lea.hbm %s3563_s1, 32768 }
   0x5   :  { %s23_s27 = sshll.u32 %s3393_s26, 4  ;;  %p3346_p0 = scmp.ne.s32.totalorder %s3563_s1, %s3345_s30  ;;  %s24_s27 = int_to_ptr.vmem [resolvable:$true] %s23_s27 }
   0x6   :  { %p3349_p1 = scmp.lt.u32.totalorder %s3345_s30, %s3563_s1 }
   0x8   :  { %p3351_p2 = pnand %p3349_p1, %p3346_p0 }
   0xa   :  { %3354 = shalt.err (!%p3351_p2)
}
   0xb   :  { %s3355_s6 = scalar_lea.vmem %s24_s27, 32768  ;;  %p3360_p4 = scmp.lt.s32.totalorder %s24_s27, %s24_s27 }
   0xc   :  { %p3356_p3 = scmp.ne.s32.totalorder %s24_s27, %s3355_s6  ;;  %p3361_p5 = scmp.lt.s32.totalorder %s3355_s6, %s3355_s6 }
   0xe   :  { %p3362_p6 = por %p3361_p5, %p3360_p4 }
  0x10   :  { %p3363_p7 = pnand %p3362_p6, %p3356_p3 }
  0x12   :  { %3366 = shalt.err (!%p3363_p7)
}
  0x13   :  { %s3394_s12 = smov 256   ;;  %s3395_s13 = smov 16  }
  0x14   :  { %29 = dma.hbm_to_vmem [thread:$0]  %s3563_s1, 32768, %s24_s27, [#allocation5], %s3394_s12, %s3394_s12, %s3395_s13  }
  0x15   :  { %s3396_s16 = smov [#allocation6]   ;;  %s3367_s20 = scalar_lea.hbm %s3565_s3, 8192 }
  0x16   :  { %s37_s17 = sshll.u32 %s3396_s16, 4  ;;  %p3368_p8 = scmp.ne.s32.totalorder %s3565_s3, %s3367_s20  ;;  %s38_s17 = int_to_ptr.vmem [resolvable:$true] %s37_s17 }
  0x17   :  { %p3371_p9 = scmp.lt.u32.totalorder %s3367_s20, %s3565_s3 }
  0x19   :  { %p3373_p10 = pnand %p3371_p9, %p3368_p8 }
  0x1b   :  { %3376 = shalt.err (!%p3373_p10)
}
  0x1c   :  { %s3377_s25 = scalar_lea.vmem %s38_s17, 8192  ;;  %p3382_p12 = scmp.lt.s32.totalorder %s38_s17, %s38_s17 }
  0x1d   :  { %p3378_p11 = scmp.ne.s32.totalorder %s38_s17, %s3377_s25  ;;  %p3383_p13 = scmp.lt.s32.totalorder %s3377_s25, %s3377_s25 }
  0x1f   :  { %p3384_p0 = por %p3383_p13, %p3382_p12 }
  0x21   :  { %p3385_p1 = pnand %p3384_p0, %p3378_p11 }
  0x23   :  { %3388 = shalt.err (!%p3385_p1)
}
  0x24   :  { %s3397_s1 = smov 128   ;;  %s3398_s26 = smov 8  }
  0x25   :  { %43 = dma.hbm_to_vmem [thread:$0]  %s3565_s3, 8192, %s38_s17, [#allocation7], %s3397_s1, %s3397_s1, %s3398_s26  }
  0x26   :  { %3389 = dma.done.wait [#allocation5], 32768  }
  0x27   :  { %3390 = vsyncadd [#allocation5], 4294934528 }
  0x28   :  { %3391 = dma.done.wait [#allocation7], 8192  }
  0x29   :  { %3392 = vsyncadd [#allocation7], 4294959104  ;;  %v2861_v1 = vld [vmem:[#allocation4 + $0x4] ss:$16 sps:$4 sm:$0xff]   ;;  %v2863_v2 = vld [vmem:[#allocation4] ss:$16 sps:$4 sm:$0xff]  }
  0x2a   :  { %1620 = vmatprep.subr.bf16.mxu1 %v2861_v1  ;;  %v2864_v3 = vld [vmem:[#allocation4 + $0x24] ss:$16 sps:$4 sm:$0xff]   ;;  %v2866_v4 = vld [vmem:[#allocation4 + $0x20] ss:$16 sps:$4 sm:$0xff]   ;;  %vm2520_vm6 = vcmask 7168  }
  0x2b   :  { %1621 = vmatpush1.bf16.msra.mxu1 %v2863_v2  ;;  %v2867_v5 = vld [vmem:[#allocation4 + $0x44] ss:$16 sps:$4 sm:$0xff]   ;;  %v2869_v6 = vld [vmem:[#allocation4 + $0x40] ss:$16 sps:$4 sm:$0xff]  }
  0x2c   :  { %1622 = vmatprep.subr.bf16.mxu1 %v2864_v3  ;;  %v2870_v7 = vld [vmem:[#allocation4 + $0x64] ss:$16 sps:$4 sm:$0xff]   ;;  %v2872_v8 = vld [vmem:[#allocation4 + $0x60] ss:$16 sps:$4 sm:$0xff]  }
  0x2d   :  { %v2873_v9 = vld [vmem:[#allocation4 + $0x84] ss:$16 sps:$4 sm:$0xff]   ;;  %v2875_v10 = vld [vmem:[#allocation4 + $0x80] ss:$16 sps:$4 sm:$0xff]  }
  0x2e   :  { %v2876_v11 = vld [vmem:[#allocation4 + $0xa4] ss:$16 sps:$4 sm:$0xff]   ;;  %v2878_v12 = vld [vmem:[#allocation4 + $0xa0] ss:$16 sps:$4 sm:$0xff]  }
  0x2f   :  { %1623 = vmatpush1.bf16.msra.mxu1 %v2866_v4  ;;  %v2879_v13 = vld [vmem:[#allocation4 + $0xc4] ss:$16 sps:$4 sm:$0xff]   ;;  %v2881_v15 = vld [vmem:[#allocation4 + $0xc0] ss:$16 sps:$4 sm:$0xff]  }
  0x30   :  { %1624 = vmatprep.subr.bf16.mxu1 %v2867_v5  ;;  %v69_v14 = vld [vmem:[%s3562_s0 + $0x8] sm:$0xff]  ;;  %v2914_v19 = vld [vmem:[#allocation4 + $0x400] ss:$16 sps:$4 sm:$0xff]   ;;  %v71_v63 = vld [vmem:[%s3562_s0 + $0x18] sm:$0xff] }
  0x31   :  { %v3469_v16 = vpack.c.bf16 %v69_v14, %v69_v14  ;;  %v2882_v17 = vld [vmem:[#allocation4 + $0xe4] ss:$16 sps:$4 sm:$0xff]   ;;  %v2884_v20 = vld [vmem:[#allocation4 + $0xe0] ss:$16 sps:$4 sm:$0xff]   ;;  %v3480_v0 = vpack.c.bf16 %v71_v63, %v71_v63 }
  0x32   :  { %v2912_v18 = vld [vmem:[#allocation4 + $0x404] ss:$16 sps:$4 sm:$0xff]   ;;  %v2920_v22 = vld [vmem:[#allocation4 + $0x420] ss:$16 sps:$4 sm:$0xff]  }
  0x33   :  { %1625 = vmatpush1.bf16.msra.mxu1 %v2869_v6  ;;  %1652 = vmatprep.mubr.bf16.mxu1 %v3469_v16  ;;  %v2918_v21 = vld [vmem:[#allocation4 + $0x424] ss:$16 sps:$4 sm:$0xff]   ;;  %v2887_v25 = vld [vmem:[#allocation4 + $0x100] ss:$16 sps:$4 sm:$0xff]  }
  0x34   :  { %1626 = vmatprep.subr.bf16.mxu1 %v2870_v7  ;;  %1702 = vmatprep.subr.bf16.mxu0 %v2912_v18  ;;  %v2885_v23 = vld [vmem:[#allocation4 + $0x104] ss:$16 sps:$4 sm:$0xff]   ;;  %v2926_v26 = vld [vmem:[#allocation4 + $0x440] ss:$16 sps:$4 sm:$0xff]  }
  0x35   :  { %1703 = vmatpush1.bf16.msra.mxu0 %v2914_v19  ;;  %v2924_v24 = vld [vmem:[#allocation4 + $0x444] ss:$16 sps:$4 sm:$0xff]   ;;  %v2890_v29 = vld [vmem:[#allocation4 + $0x120] ss:$16 sps:$4 sm:$0xff]  }
  0x36   :  { %1704 = vmatprep.subr.bf16.mxu0 %v2918_v21  ;;  %v2888_v27 = vld [vmem:[#allocation4 + $0x124] ss:$16 sps:$4 sm:$0xff]   ;;  %v2932_v30 = vld [vmem:[#allocation4 + $0x460] ss:$16 sps:$4 sm:$0xff]  }
  0x37   :  { %1627 = vmatpush1.bf16.msra.mxu1 %v2872_v8  ;;  %v2930_v28 = vld [vmem:[#allocation4 + $0x464] ss:$16 sps:$4 sm:$0xff]   ;;  %v2893_v33 = vld [vmem:[#allocation4 + $0x140] ss:$16 sps:$4 sm:$0xff]  }
  0x38   :  { %1628 = vmatprep.subr.bf16.mxu1 %v2873_v9  ;;  %v2891_v31 = vld [vmem:[#allocation4 + $0x144] ss:$16 sps:$4 sm:$0xff]   ;;  %v2938_v34 = vld [vmem:[#allocation4 + $0x480] ss:$16 sps:$4 sm:$0xff]  }
  0x39   :  { %1705 = vmatpush1.bf16.msra.mxu0 %v2920_v22  ;;  %v2936_v32 = vld [vmem:[#allocation4 + $0x484] ss:$16 sps:$4 sm:$0xff]   ;;  %v2896_v37 = vld [vmem:[#allocation4 + $0x160] ss:$16 sps:$4 sm:$0xff]  }
  0x3a   :  { %1706 = vmatprep.subr.bf16.mxu0 %v2924_v24  ;;  %v2894_v35 = vld [vmem:[#allocation4 + $0x164] ss:$16 sps:$4 sm:$0xff]   ;;  %v2944_v38 = vld [vmem:[#allocation4 + $0x4a0] ss:$16 sps:$4 sm:$0xff]   ;;  %v3010_v24 = vld [vmem:[#allocation4 + $0xc] ss:$16 sps:$4 sm:$0xff]  }
  0x3b   :  { %1629 = vmatpush1.bf16.msra.mxu1 %v2875_v10  ;;  %v2942_v36 = vld [vmem:[#allocation4 + $0x4a4] ss:$16 sps:$4 sm:$0xff]   ;;  %v2899_v41 = vld [vmem:[#allocation4 + $0x180] ss:$16 sps:$4 sm:$0xff]  }
  0x3c   :  { %1630 = vmatprep.subr.bf16.mxu1 %v2876_v11  ;;  %v2897_v39 = vld [vmem:[#allocation4 + $0x184] ss:$16 sps:$4 sm:$0xff]   ;;  %v2950_v42 = vld [vmem:[#allocation4 + $0x4c0] ss:$16 sps:$4 sm:$0xff]  }
  0x3d   :  { %1707 = vmatpush1.bf16.msra.mxu0 %v2926_v26  ;;  %v2948_v40 = vld [vmem:[#allocation4 + $0x4c4] ss:$16 sps:$4 sm:$0xff]   ;;  %v2902_v45 = vld [vmem:[#allocation4 + $0x1a0] ss:$16 sps:$4 sm:$0xff]  }
  0x3e   :  { %1708 = vmatprep.subr.bf16.mxu0 %v2930_v28  ;;  %v2900_v43 = vld [vmem:[#allocation4 + $0x1a4] ss:$16 sps:$4 sm:$0xff]   ;;  %v2956_v46 = vld [vmem:[#allocation4 + $0x4e0] ss:$16 sps:$4 sm:$0xff]  }
  0x3f   :  { %1631 = vmatpush1.bf16.msra.mxu1 %v2878_v12  ;;  %v2954_v44 = vld [vmem:[#allocation4 + $0x4e4] ss:$16 sps:$4 sm:$0xff]   ;;  %v2905_v49 = vld [vmem:[#allocation4 + $0x1c0] ss:$16 sps:$4 sm:$0xff]  }
  0x40   :  { %1632 = vmatprep.subr.bf16.mxu1 %v2879_v13  ;;  %v2903_v47 = vld [vmem:[#allocation4 + $0x1c4] ss:$16 sps:$4 sm:$0xff]   ;;  %v2962_v50 = vld [vmem:[#allocation4 + $0x500] ss:$16 sps:$4 sm:$0xff]  }
  0x41   :  { %1709 = vmatpush1.bf16.msra.mxu0 %v2932_v30  ;;  %v2960_v48 = vld [vmem:[#allocation4 + $0x504] ss:$16 sps:$4 sm:$0xff]   ;;  %v2908_v53 = vld [vmem:[#allocation4 + $0x1e0] ss:$16 sps:$4 sm:$0xff]  }
  0x42   :  { %1710 = vmatprep.subr.bf16.mxu0 %v2936_v32  ;;  %v2906_v51 = vld [vmem:[#allocation4 + $0x1e4] ss:$16 sps:$4 sm:$0xff]   ;;  %v2968_v55 = vld [vmem:[#allocation4 + $0x520] ss:$16 sps:$4 sm:$0xff]  }
  0x43   :  { %1633 = vmatpush1.bf16.msra.mxu1 %v2881_v15  ;;  %v2966_v52 = vld [vmem:[#allocation4 + $0x524] ss:$16 sps:$4 sm:$0xff]   ;;  %v2909_v59 = vld [vmem:[#allocation4 + $0x200] ss:$16 sps:$4 sm:$0xff]  }
  0x44   :  { %1634 = vmatprep.subr.bf16.mxu1 %v2882_v17  ;;  %v68_v54 = vld [vmem:[%s3562_s0] sm:$0xff]  ;;  %v73_v2 = vld [vmem:[%s3562_s0 + $0x28] sm:$0xff]  ;;  %v70_v63 = vld [vmem:[%s3562_s0 + $0x10] sm:$0xff] }
  0x45   :  { %1711 = vmatpush1.bf16.msra.mxu0 %v2938_v34  ;;  %v2911_v56 = vld [vmem:[#allocation4 + $0x204] ss:$16 sps:$4 sm:$0xff]   ;;  %v3475_v58 = vpack.c.bf16 %v68_v54, %v68_v54  ;;  %v2974_v60 = vld [vmem:[#allocation4 + $0x540] ss:$16 sps:$4 sm:$0xff]   ;;  %v3486_v4 = vpack.c.bf16 %v73_v2, %v73_v2  ;;  %v3062_v2 = vld [vmem:[#allocation4 + $0x128] ss:$16 sps:$4 sm:$0xff]  }
  0x46   :  { %1712 = vmatprep.subr.bf16.mxu0 %v2942_v36  ;;  %v2972_v57 = vld [vmem:[#allocation4 + $0x544] ss:$16 sps:$4 sm:$0xff]   ;;  %v2915_v1 = vld [vmem:[#allocation4 + $0x220] ss:$16 sps:$4 sm:$0xff]  }
  0x47   :  { %1635 = vmatpush1.bf16.msra.mxu1 %v2884_v20  ;;  %v2917_v61 = vld [vmem:[#allocation4 + $0x224] ss:$16 sps:$4 sm:$0xff]   ;;  %v2980_v3 = vld [vmem:[#allocation4 + $0x560] ss:$16 sps:$4 sm:$0xff]   ;;  %1734 = vmatprep.mubr.bf16.mxu0 %v3486_v4 }
  0x48   :  { %1636 = vmatprep.subr.bf16.mxu1 %v2885_v23  ;;  %v2978_v62 = vld [vmem:[#allocation4 + $0x564] ss:$16 sps:$4 sm:$0xff]   ;;  %v2921_v7 = vld [vmem:[#allocation4 + $0x240] ss:$16 sps:$4 sm:$0xff]  }
  0x49   :  { %1713 = vmatpush1.bf16.msra.mxu0 %v2944_v38  ;;  %v2923_v5 = vld [vmem:[#allocation4 + $0x244] ss:$16 sps:$4 sm:$0xff]   ;;  %v2986_v8 = vld [vmem:[#allocation4 + $0x580] ss:$16 sps:$4 sm:$0xff]  }
  0x4a   :  { %1714 = vmatprep.subr.bf16.mxu0 %v2948_v40  ;;  %v2984_v6 = vld [vmem:[#allocation4 + $0x584] ss:$16 sps:$4 sm:$0xff]   ;;  %v2927_v11 = vld [vmem:[#allocation4 + $0x260] ss:$16 sps:$4 sm:$0xff]  }
  0x4b   :  { %1637 = vmatpush1.bf16.msra.mxu1 %v2887_v25  ;;  %v2929_v9 = vld [vmem:[#allocation4 + $0x264] ss:$16 sps:$4 sm:$0xff]   ;;  %v2992_v12 = vld [vmem:[#allocation4 + $0x5a0] ss:$16 sps:$4 sm:$0xff]  }
  0x4c   :  { %1638 = vmatprep.subr.bf16.mxu1 %v2888_v27  ;;  %v2990_v10 = vld [vmem:[#allocation4 + $0x5a4] ss:$16 sps:$4 sm:$0xff]   ;;  %v2933_v15 = vld [vmem:[#allocation4 + $0x280] ss:$16 sps:$4 sm:$0xff]   ;;  %v3008_v27 = vld [vmem:[#allocation4 + $0x8] ss:$16 sps:$4 sm:$0xff]  }
  0x4d   :  { %1715 = vmatpush1.bf16.msra.mxu0 %v2950_v42  ;;  %v2935_v13 = vld [vmem:[#allocation4 + $0x284] ss:$16 sps:$4 sm:$0xff]   ;;  %v2998_v17 = vld [vmem:[#allocation4 + $0x5c0] ss:$16 sps:$4 sm:$0xff]  }
  0x4e   :  { %1716 = vmatprep.subr.bf16.mxu0 %v2954_v44  ;;  %v2996_v14 = vld [vmem:[#allocation4 + $0x5c4] ss:$16 sps:$4 sm:$0xff]   ;;  %v2939_v20 = vld [vmem:[#allocation4 + $0x2a0] ss:$16 sps:$4 sm:$0xff]   ;;  %v3040_v44 = vld [vmem:[#allocation4 + $0xac] ss:$16 sps:$4 sm:$0xff]  }
  0x4f   :  { %1639 = vmatpush1.bf16.msra.mxu1 %v2890_v29  ;;  %v2941_v18 = vld [vmem:[#allocation4 + $0x2a4] ss:$16 sps:$4 sm:$0xff]   ;;  %v3004_v21 = vld [vmem:[#allocation4 + $0x5e0] ss:$16 sps:$4 sm:$0xff]   ;;  %v3016_v29 = vld [vmem:[#allocation4 + $0x2c] ss:$16 sps:$4 sm:$0xff]  }
  0x50   :  { %1640 = vmatprep.subr.bf16.mxu1 %v2891_v31  ;;  %v3002_v19 = vld [vmem:[#allocation4 + $0x5e4] ss:$16 sps:$4 sm:$0xff]   ;;  %v2945_v25 = vld [vmem:[#allocation4 + $0x2c0] ss:$16 sps:$4 sm:$0xff]   ;;  %v3014_v31 = vld [vmem:[#allocation4 + $0x28] ss:$16 sps:$4 sm:$0xff]  }
  0x51   :  { %1717 = vmatpush1.bf16.msra.mxu0 %v2956_v46  ;;  %v72_v22 = vld [vmem:[%s3562_s0 + $0x20] sm:$0xff]  ;;  %v3038_v46 = vld [vmem:[#allocation4 + $0xa8] ss:$16 sps:$4 sm:$0xff]  }
  0x52   :  { %1718 = vmatprep.subr.bf16.mxu0 %v2960_v48  ;;  %v2947_v23 = vld [vmem:[#allocation4 + $0x2c4] ss:$16 sps:$4 sm:$0xff]   ;;  %v3493_v26 = vpack.c.bf16 %v72_v22, %v72_v22  ;;  %v2951_v30 = vld [vmem:[#allocation4 + $0x2e0] ss:$16 sps:$4 sm:$0xff]   ;;  %v3046_v48 = vld [vmem:[#allocation4 + $0xcc] ss:$16 sps:$4 sm:$0xff]  }
  0x53   :  { %1641 = vmatpush1.bf16.msra.mxu1 %v2893_v33  ;;  %v2953_v28 = vld [vmem:[#allocation4 + $0x2e4] ss:$16 sps:$4 sm:$0xff]   ;;  %v3022_v33 = vld [vmem:[#allocation4 + $0x4c] ss:$16 sps:$4 sm:$0xff]   ;;  %v2957_v34 = vld [vmem:[#allocation4 + $0x300] ss:$16 sps:$4 sm:$0xff]  }
  0x54   :  { %1642 = vmatprep.subr.bf16.mxu1 %v2894_v35  ;;  %v2959_v32 = vld [vmem:[#allocation4 + $0x304] ss:$16 sps:$4 sm:$0xff]   ;;  %v3020_v35 = vld [vmem:[#allocation4 + $0x48] ss:$16 sps:$4 sm:$0xff]   ;;  %v2963_v38 = vld [vmem:[#allocation4 + $0x320] ss:$16 sps:$4 sm:$0xff]  }
  0x55   :  { %1719 = vmatpush1.bf16.msra.mxu0 %v2962_v50  ;;  %v2965_v36 = vld [vmem:[#allocation4 + $0x324] ss:$16 sps:$4 sm:$0xff]   ;;  %v2969_v42 = vld [vmem:[#allocation4 + $0x340] ss:$16 sps:$4 sm:$0xff]  }
  0x56   :  { %1720 = vmatprep.subr.bf16.mxu0 %v2966_v52  ;;  %v2971_v40 = vld [vmem:[#allocation4 + $0x344] ss:$16 sps:$4 sm:$0xff]   ;;  %v3052_v52 = vld [vmem:[#allocation4 + $0xec] ss:$16 sps:$4 sm:$0xff]  }
  0x57   :  { %1643 = vmatpush1.bf16.msra.mxu1 %v2896_v37  ;;  %v3028_v37 = vld [vmem:[#allocation4 + $0x6c] ss:$16 sps:$4 sm:$0xff]   ;;  %v2989_v50 = vld [vmem:[#allocation4 + $0x3a4] ss:$16 sps:$4 sm:$0xff]  }
  0x58   :  { %1644 = vmatprep.subr.bf16.mxu1 %v2897_v39  ;;  %v3026_v39 = vld [vmem:[#allocation4 + $0x68] ss:$16 sps:$4 sm:$0xff]   ;;  %v2995_v54 = vld [vmem:[#allocation4 + $0x3c4] ss:$16 sps:$4 sm:$0xff]  }
  0x59   :  { %1721 = vmatpush1.bf16.msra.mxu0 %v2968_v55  ;;  %v3050_v55 = vld [vmem:[#allocation4 + $0xe8] ss:$16 sps:$4 sm:$0xff]   ;;  %v3031_v22 = vld [vmem:[#allocation4 + $0x684] ss:$16 sps:$4 sm:$0xff]  }
  0x5a   :  { %1722 = vmatprep.subr.bf16.mxu0 %v2972_v57  ;;  %v2993_v57 = vld [vmem:[#allocation4 + $0x3c0] ss:$16 sps:$4 sm:$0xff]  }
  0x5b   :  { %1645 = vmatpush1.bf16.msra.mxu1 %v2899_v41  ;;  %v3034_v41 = vld [vmem:[#allocation4 + $0x8c] ss:$16 sps:$4 sm:$0xff]  }
  0x5c   :  { %1646 = vmatprep.subr.bf16.mxu1 %v2900_v43  ;;  %v2977_v43 = vld [vmem:[#allocation4 + $0x364] ss:$16 sps:$4 sm:$0xff]  }
  0x5d   :  { %1723 = vmatpush1.bf16.msra.mxu0 %v2974_v60  ;;  %v3056_v60 = vld [vmem:[#allocation4 + $0x108] ss:$16 sps:$4 sm:$0xff]  }
  0x5e   :  { %1724 = vmatprep.subr.bf16.mxu0 %v2978_v62  ;;  %v2999_v62 = vld [vmem:[#allocation4 + $0x3e0] ss:$16 sps:$4 sm:$0xff]  }
  0x5f   :  { %1647 = vmatpush1.bf16.msra.mxu1 %v2902_v45  ;;  %v2975_v45 = vld [vmem:[#allocation4 + $0x360] ss:$16 sps:$4 sm:$0xff]  }
  0x60   :  { %1648 = vmatprep.subr.bf16.mxu1 %v2903_v47  ;;  %v2983_v47 = vld [vmem:[#allocation4 + $0x384] ss:$16 sps:$4 sm:$0xff]  }
  0x61   :  { %1725 = vmatpush1.bf16.msra.mxu0 %v2980_v3  ;;  %v3070_v3 = vld [vmem:[#allocation4 + $0x14c] ss:$16 sps:$4 sm:$0xff]  }
  0x62   :  { %1726 = vmatprep.subr.bf16.mxu0 %v2984_v6  ;;  %v3005_v6 = vld [vmem:[#allocation4 + $0x600] ss:$16 sps:$4 sm:$0xff]  }
  0x63   :  { %1649 = vmatpush1.bf16.msra.mxu1 %v2905_v49  ;;  %v2981_v49 = vld [vmem:[#allocation4 + $0x380] ss:$16 sps:$4 sm:$0xff]  }
  0x64   :  { %1650 = vmatprep.subr.bf16.mxu1 %v2906_v51  ;;  %v3044_v51 = vld [vmem:[#allocation4 + $0xc8] ss:$16 sps:$4 sm:$0xff]  }
  0x65   :  { %1727 = vmatpush1.bf16.msra.mxu0 %v2986_v8  ;;  %v3013_v8 = vld [vmem:[#allocation4 + $0x624] ss:$16 sps:$4 sm:$0xff]  }
  0x66   :  { %1728 = vmatprep.subr.bf16.mxu0 %v2990_v10  ;;  %v3076_v10 = vld [vmem:[#allocation4 + $0x16c] ss:$16 sps:$4 sm:$0xff]  }
  0x67   :  { %1651 = vmatpush1.bf16.msra.mxu1 %v2908_v53  ;;  %v2987_v53 = vld [vmem:[#allocation4 + $0x3a0] ss:$16 sps:$4 sm:$0xff]  }
  0x68   :  { %1661 = vmatprep.subr.bf16.mxu1 %v2911_v56  ;;  %v3058_v56 = vld [vmem:[#allocation4 + $0x10c] ss:$16 sps:$4 sm:$0xff]  }
  0x69   :  { %1729 = vmatpush1.bf16.msra.mxu0 %v2992_v12  ;;  %v3011_v12 = vld [vmem:[#allocation4 + $0x620] ss:$16 sps:$4 sm:$0xff]  }
  0x6a   :  { %1653 = vmatmul.mubr.bf16.vlgmr.msra.gmra.mrb[0].mxu1 %v3475_v58  ;;  %1730 = vmatprep.subr.bf16.mxu0 %v2996_v14  ;;  %v3074_v14 = vld [vmem:[#allocation4 + $0x168] ss:$16 sps:$4 sm:$0xff]  }
  0x6b   :  { %1662 = vmatpush1.bf16.msra.mxu1 %v2909_v59  ;;  %1693 = vmatprep.mubr.bf16.mxu1 %v3480_v0  ;;  %v3001_v59 = vld [vmem:[#allocation4 + $0x3e4] ss:$16 sps:$4 sm:$0xff]  }
  0x6c   :  { %1663 = vmatprep.subr.bf16.mxu1 %v2917_v61  ;;  %v3064_v61 = vld [vmem:[#allocation4 + $0x12c] ss:$16 sps:$4 sm:$0xff]  }
  0x6d   :  { %1731 = vmatpush1.bf16.msra.mxu0 %v2998_v17  ;;  %v3017_v17 = vld [vmem:[#allocation4 + $0x640] ss:$16 sps:$4 sm:$0xff]  }
  0x6e   :  { %1732 = vmatprep.subr.bf16.mxu0 %v3002_v19  ;;  %v3080_v19 = vld [vmem:[#allocation4 + $0x188] ss:$16 sps:$4 sm:$0xff]  }
  0x6f   :  { %1664 = vmatpush1.bf16.msra.mxu1 %v2915_v1  ;;  %v3007_v1 = vld [vmem:[#allocation4 + $0x604] ss:$16 sps:$4 sm:$0xff]  }
  0x70   :  { %1665 = vmatprep.subr.bf16.mxu1 %v2923_v5  ;;  %v3500_v5 = vpack.c.bf16 %v70_v63, %v70_v63  ;;  %v3154_v63 = vld [vmem:[#allocation4 + $0x50c] ss:$16 sps:$4 sm:$0xff]  }
  0x71   :  { %1733 = vmatpush1.bf16.msra.mxu0 %v3004_v21  ;;  %v3023_v21 = vld [vmem:[#allocation4 + $0x660] ss:$16 sps:$4 sm:$0xff]  }
  0x72   :  { %1784 = vmatprep.subr.bf16.mxu0 %v3010_v24  ;;  %v3094_v24 = vld [vmem:[#allocation4 + $0x1cc] ss:$16 sps:$4 sm:$0xff]  }
  0x73   :  { %1666 = vmatpush1.bf16.msra.mxu1 %v2921_v7  ;;  %v75_v7 = vld [vmem:[%s3562_s0 + $0x38] sm:$0xff] }
  0x74   :  { %1667 = vmatprep.subr.bf16.mxu1 %v2929_v9  ;;  %1735 = vmatmul.mubr.bf16.vlgmr.msra.gmra.mrb[0].mxu0 %v3493_v26  ;;  %v3068_v9 = vld [vmem:[#allocation4 + $0x148] ss:$16 sps:$4 sm:$0xff]  }
  0x75   :  { %1785 = vmatpush1.bf16.msra.mxu0 %v3008_v27  ;;  %1816 = vmatprep.mubr.bf16.mxu0 %v3469_v16  ;;  %v3032_v16 = vld [vmem:[#allocation4 + $0x88] ss:$16 sps:$4 sm:$0xff]   ;;  %v3037_v27 = vld [vmem:[#allocation4 + $0x6a4] ss:$16 sps:$4 sm:$0xff]  }
  0x76   :  { %1786 = vmatprep.subr.bf16.mxu0 %v3016_v29  ;;  %v3100_v29 = vld [vmem:[#allocation4 + $0x1ec] ss:$16 sps:$4 sm:$0xff]  }
  0x77   :  { %1668 = vmatpush1.bf16.msra.mxu1 %v2927_v11  ;;  %v3505_v11 = vpack.c.bf16 %v75_v7, %v75_v7  ;;  %v3095_v7 = vld [vmem:[#allocation4 + $0x7e0] ss:$16 sps:$4 sm:$0xff]  }
  0x78   :  { %1669 = vmatprep.subr.bf16.mxu1 %v2935_v13  ;;  %v3019_v13 = vld [vmem:[#allocation4 + $0x644] ss:$16 sps:$4 sm:$0xff]  }
  0x79   :  { %1787 = vmatpush1.bf16.msra.mxu0 %v3014_v31  ;;  %v3043_v31 = vld [vmem:[#allocation4 + $0x6c4] ss:$16 sps:$4 sm:$0xff]  }
  0x7a   :  { %1788 = vmatprep.subr.bf16.mxu0 %v3022_v33  ;;  %v3106_v33 = vld [vmem:[#allocation4 + $0x40c] ss:$16 sps:$4 sm:$0xff]  }
  0x7b   :  { %1670 = vmatpush1.bf16.msra.mxu1 %v2933_v15  ;;  %v3082_v15 = vld [vmem:[#allocation4 + $0x18c] ss:$16 sps:$4 sm:$0xff]  }
  0x7c   :  { %1671 = vmatprep.subr.bf16.mxu1 %v2941_v18  ;;  %v3025_v18 = vld [vmem:[#allocation4 + $0x664] ss:$16 sps:$4 sm:$0xff]  }
  0x7d   :  { %1789 = vmatpush1.bf16.msra.mxu0 %v3020_v35  ;;  %v3049_v35 = vld [vmem:[#allocation4 + $0x6e4] ss:$16 sps:$4 sm:$0xff]  }
  0x7e   :  { %1790 = vmatprep.subr.bf16.mxu0 %v3028_v37  ;;  %v3112_v37 = vld [vmem:[#allocation4 + $0x42c] ss:$16 sps:$4 sm:$0xff]  }
  0x7f   :  { %1672 = vmatpush1.bf16.msra.mxu1 %v2939_v20  ;;  %v3088_v20 = vld [vmem:[#allocation4 + $0x1ac] ss:$16 sps:$4 sm:$0xff]  }
  0x80   :  { %1673 = vmatprep.subr.bf16.mxu1 %v2947_v23  ;;  %v3086_v23 = vld [vmem:[#allocation4 + $0x1a8] ss:$16 sps:$4 sm:$0xff]  }
  0x81   :  { %1791 = vmatpush1.bf16.msra.mxu0 %v3026_v39  ;;  %v3055_v39 = vld [vmem:[#allocation4 + $0x704] ss:$16 sps:$4 sm:$0xff]  }
  0x82   :  { %1792 = vmatprep.subr.bf16.mxu0 %v3034_v41  ;;  %v3118_v41 = vld [vmem:[#allocation4 + $0x44c] ss:$16 sps:$4 sm:$0xff]  }
  0x83   :  { %1674 = vmatpush1.bf16.msra.mxu1 %v2945_v25  ;;  %v3029_v25 = vld [vmem:[#allocation4 + $0x680] ss:$16 sps:$4 sm:$0xff]  }
  0x84   :  { %1675 = vmatprep.subr.bf16.mxu1 %v2953_v28  ;;  %v3092_v28 = vld [vmem:[#allocation4 + $0x1c8] ss:$16 sps:$4 sm:$0xff]  }
  0x85   :  { %1793 = vmatpush1.bf16.msra.mxu0 %v3032_v16  ;;  %v3061_v16 = vld [vmem:[#allocation4 + $0x724] ss:$16 sps:$4 sm:$0xff]  }
  0x86   :  { %1794 = vmatprep.subr.bf16.mxu0 %v3040_v44  ;;  %v3124_v44 = vld [vmem:[#allocation4 + $0x46c] ss:$16 sps:$4 sm:$0xff]  }
  0x87   :  { %1676 = vmatpush1.bf16.msra.mxu1 %v2951_v30  ;;  %v3035_v30 = vld [vmem:[#allocation4 + $0x6a0] ss:$16 sps:$4 sm:$0xff]  }
  0x88   :  { %1677 = vmatprep.subr.bf16.mxu1 %v2959_v32  ;;  %v3098_v32 = vld [vmem:[#allocation4 + $0x1e8] ss:$16 sps:$4 sm:$0xff]  }
  0x89   :  { %1795 = vmatpush1.bf16.msra.mxu0 %v3038_v46  ;;  %v3122_v46 = vld [vmem:[#allocation4 + $0x468] ss:$16 sps:$4 sm:$0xff]  }
  0x8a   :  { %1796 = vmatprep.subr.bf16.mxu0 %v3046_v48  ;;  %v3065_v48 = vld [vmem:[#allocation4 + $0x740] ss:$16 sps:$4 sm:$0xff]  }
  0x8b   :  { %1678 = vmatpush1.bf16.msra.mxu1 %v2957_v34  ;;  %v3041_v34 = vld [vmem:[#allocation4 + $0x6c0] ss:$16 sps:$4 sm:$0xff]  }
  0x8c   :  { %1679 = vmatprep.subr.bf16.mxu1 %v2965_v36  ;;  %v3104_v36 = vld [vmem:[#allocation4 + $0x408] ss:$16 sps:$4 sm:$0xff]  }
  0x8d   :  { %1797 = vmatpush1.bf16.msra.mxu0 %v3044_v51  ;;  %v3071_v51 = vld [vmem:[#allocation4 + $0x760] ss:$16 sps:$4 sm:$0xff]  }
  0x8e   :  { %1798 = vmatprep.subr.bf16.mxu0 %v3052_v52  ;;  %v3079_v52 = vld [vmem:[#allocation4 + $0x784] ss:$16 sps:$4 sm:$0xff]  }
  0x8f   :  { %1680 = vmatpush1.bf16.msra.mxu1 %v2963_v38  ;;  %v3047_v38 = vld [vmem:[#allocation4 + $0x6e0] ss:$16 sps:$4 sm:$0xff]  }
  0x90   :  { %1681 = vmatprep.subr.bf16.mxu1 %v2971_v40  ;;  %v3110_v40 = vld [vmem:[#allocation4 + $0x428] ss:$16 sps:$4 sm:$0xff]  }
  0x91   :  { %1799 = vmatpush1.bf16.msra.mxu0 %v3050_v55  ;;  %v3077_v55 = vld [vmem:[#allocation4 + $0x780] ss:$16 sps:$4 sm:$0xff]  }
  0x92   :  { %1800 = vmatprep.subr.bf16.mxu0 %v3058_v56  ;;  %v3085_v56 = vld [vmem:[#allocation4 + $0x7a4] ss:$16 sps:$4 sm:$0xff]  }
  0x93   :  { %1682 = vmatpush1.bf16.msra.mxu1 %v2969_v42  ;;  %v3053_v42 = vld [vmem:[#allocation4 + $0x700] ss:$16 sps:$4 sm:$0xff]  }
  0x94   :  { %1683 = vmatprep.subr.bf16.mxu1 %v2977_v43  ;;  %v3116_v43 = vld [vmem:[#allocation4 + $0x448] ss:$16 sps:$4 sm:$0xff]  }
  0x95   :  { %1801 = vmatpush1.bf16.msra.mxu0 %v3056_v60  ;;  %v3083_v60 = vld [vmem:[#allocation4 + $0x7a0] ss:$16 sps:$4 sm:$0xff]  }
  0x96   :  { %1802 = vmatprep.subr.bf16.mxu0 %v3064_v61  ;;  %v3091_v61 = vld [vmem:[#allocation4 + $0x7c4] ss:$16 sps:$4 sm:$0xff]  }
  0x97   :  { %1684 = vmatpush1.bf16.msra.mxu1 %v2975_v45  ;;  %v3059_v45 = vld [vmem:[#allocation4 + $0x720] ss:$16 sps:$4 sm:$0xff]  }
  0x98   :  { %1685 = vmatprep.subr.bf16.mxu1 %v2983_v47  ;;  %v3130_v47 = vld [vmem:[#allocation4 + $0x48c] ss:$16 sps:$4 sm:$0xff]  }
  0x99   :  { %1803 = vmatpush1.bf16.msra.mxu0 %v3062_v2  ;;  %v3097_v2 = vld [vmem:[#allocation4 + $0x7e4] ss:$16 sps:$4 sm:$0xff]  }
  0x9a   :  { %1804 = vmatprep.subr.bf16.mxu0 %v3070_v3  ;;  %v3152_v3 = vld [vmem:[#allocation4 + $0x508] ss:$16 sps:$4 sm:$0xff]  }
  0x9b   :  { %1686 = vmatpush1.bf16.msra.mxu1 %v2981_v49  ;;  %v3073_v49 = vld [vmem:[#allocation4 + $0x764] ss:$16 sps:$4 sm:$0xff]  }
  0x9c   :  { %1687 = vmatprep.subr.bf16.mxu1 %v2989_v50  ;;  %v3136_v50 = vld [vmem:[#allocation4 + $0x4ac] ss:$16 sps:$4 sm:$0xff]  }
  0x9d   :  { %1805 = vmatpush1.bf16.msra.mxu0 %v3068_v9  ;;  %v3103_v9 = vld [vmem:[#allocation4 + $0x20c] ss:$16 sps:$4 sm:$0xff]  }
  0x9e   :  { %1806 = vmatprep.subr.bf16.mxu0 %v3076_v10  ;;  %v3158_v10 = vld [vmem:[#allocation4 + $0x528] ss:$16 sps:$4 sm:$0xff]  }
  0x9f   :  { %1688 = vmatpush1.bf16.msra.mxu1 %v2987_v53  ;;  %v3134_v53 = vld [vmem:[#allocation4 + $0x4a8] ss:$16 sps:$4 sm:$0xff]  }
  0xa0   :  { %1689 = vmatprep.subr.bf16.mxu1 %v2995_v54  ;;  %v3142_v54 = vld [vmem:[#allocation4 + $0x4cc] ss:$16 sps:$4 sm:$0xff]  }
  0xa1   :  { %1807 = vmatpush1.bf16.msra.mxu0 %v3074_v14  ;;  %v3164_v14 = vld [vmem:[#allocation4 + $0x548] ss:$16 sps:$4 sm:$0xff]  }
  0xa2   :  { %1808 = vmatprep.subr.bf16.mxu0 %v3082_v15 }
  0xa3   :  { %1690 = vmatpush1.bf16.msra.mxu1 %v2993_v57  ;;  %v3140_v57 = vld [vmem:[#allocation4 + $0x4c8] ss:$16 sps:$4 sm:$0xff]  }
  0xa4   :  { %1691 = vmatprep.subr.bf16.mxu1 %v3001_v59  ;;  %v3148_v59 = vld [vmem:[#allocation4 + $0x4ec] ss:$16 sps:$4 sm:$0xff]  }
  0xa5   :  { %1809 = vmatpush1.bf16.msra.mxu0 %v3080_v19  ;;  %v3107_v19 = vld [vmem:[#allocation4 + $0x228] ss:$16 sps:$4 sm:$0xff]  }
  0xa6   :  { %1810 = vmatprep.subr.bf16.mxu0 %v3088_v20  ;;  %v3170_v20 = vld [vmem:[#allocation4 + $0x568] ss:$16 sps:$4 sm:$0xff]  }
  0xa7   :  { %1692 = vmatpush1.bf16.msra.mxu1 %v2999_v62  ;;  %v3146_v62 = vld [vmem:[#allocation4 + $0x4e8] ss:$16 sps:$4 sm:$0xff]  }
  0xa8   :  { %1743 = vmatprep.subr.bf16.mxu1 %v3007_v1  ;;  %v3089_v1 = vld [vmem:[#allocation4 + $0x7c0] ss:$16 sps:$4 sm:$0xff]  }
  0xa9   :  { %1811 = vmatpush1.bf16.msra.mxu0 %v3086_v23  ;;  %v3113_v23 = vld [vmem:[#allocation4 + $0x248] ss:$16 sps:$4 sm:$0xff]  }
  0xaa   :  { %1694 = vmatmul.mubr.bf16.vlgmr.msra.gmra.mrb[4].mxu1 %v3500_v5  ;;  %1812 = vmatprep.subr.bf16.mxu0 %v3094_v24  ;;  %v3176_v24 = vld [vmem:[#allocation4 + $0x588] ss:$16 sps:$4 sm:$0xff]  }
  0xab   :  { %1744 = vmatpush1.bf16.msra.mxu1 %v3005_v6  ;;  %1775 = vmatprep.mubr.bf16.mxu1 %v3505_v11  ;;  %v3160_v6 = vld [vmem:[#allocation4 + $0x52c] ss:$16 sps:$4 sm:$0xff]  }
  0xac   :  { %1745 = vmatprep.subr.bf16.mxu1 %v3013_v8  ;;  %v74_v8 = vld [vmem:[%s3562_s0 + $0x30] sm:$0xff] }
  0xad   :  { %1813 = vmatpush1.bf16.msra.mxu0 %v3092_v28  ;;  %v3514_v15 = vpack.c.bf16 %v74_v8, %v74_v8  ;;  %v3119_v28 = vld [vmem:[#allocation4 + $0x268] ss:$16 sps:$4 sm:$0xff]   ;;  %v3193_v8 = vld [vmem:[#allocation4 + $0x3ec] ss:$16 sps:$4 sm:$0xff]  }
  0xae   :  { %1814 = vmatprep.subr.bf16.mxu0 %v3100_v29  ;;  %v3182_v29 = vld [vmem:[#allocation4 + $0x5a8] ss:$16 sps:$4 sm:$0xff]  }
  0xaf   :  { %1746 = vmatpush1.bf16.msra.mxu1 %v3011_v12  ;;  %v3166_v12 = vld [vmem:[#allocation4 + $0x54c] ss:$16 sps:$4 sm:$0xff]  }
  0xb0   :  { %1747 = vmatprep.subr.bf16.mxu1 %v3019_v13  ;;  %v3101_v13 = vld [vmem:[#allocation4 + $0x208] ss:$16 sps:$4 sm:$0xff]  }
  0xb1   :  { %1815 = vmatpush1.bf16.msra.mxu0 %v3098_v32  ;;  %v3125_v32 = vld [vmem:[#allocation4 + $0x288] ss:$16 sps:$4 sm:$0xff]  }
  0xb2   :  { %1866 = vmatprep.subr.bf16.mxu0 %v3106_v33  ;;  %v3133_v33 = vld [vmem:[#allocation4 + $0x2ac] ss:$16 sps:$4 sm:$0xff]  }
  0xb3   :  { %1748 = vmatpush1.bf16.msra.mxu1 %v3017_v17  ;;  %v3109_v17 = vld [vmem:[#allocation4 + $0x22c] ss:$16 sps:$4 sm:$0xff]  }
  0xb4   :  { %1749 = vmatprep.subr.bf16.mxu1 %v3025_v18  ;;  %1817 = vmatmul.mubr.bf16.vlgmr.msra.gmra.mrb[4].mxu0 %v3475_v58  ;;  %v3067_v58 = vld [vmem:[#allocation4 + $0x744] ss:$16 sps:$4 sm:$0xff]   ;;  %v3172_v18 = vld [vmem:[#allocation4 + $0x56c] ss:$16 sps:$4 sm:$0xff]  }
  0xb5   :  { %1867 = vmatpush1.bf16.msra.mxu0 %v3104_v36  ;;  %1898 = vmatprep.mubr.bf16.mxu0 %v3486_v4  ;;  %v3128_v4 = vld [vmem:[#allocation4 + $0x488] ss:$16 sps:$4 sm:$0xff]  }
  0xb6   :  { %1868 = vmatprep.subr.bf16.mxu0 %v3112_v37  ;;  %v3194_v36 = vld [vmem:[#allocation4 + $0x5e8] ss:$16 sps:$4 sm:$0xff]   ;;  %v3139_v37 = vld [vmem:[#allocation4 + $0x2cc] ss:$16 sps:$4 sm:$0xff]  }
  0xb7   :  { %1750 = vmatpush1.bf16.msra.mxu1 %v3023_v21  ;;  %v3115_v21 = vld [vmem:[#allocation4 + $0x24c] ss:$16 sps:$4 sm:$0xff]  }
  0xb8   :  { %1751 = vmatprep.subr.bf16.mxu1 %v3031_v22  ;;  %v3178_v22 = vld [vmem:[#allocation4 + $0x58c] ss:$16 sps:$4 sm:$0xff]  }
  0xb9   :  { %1869 = vmatpush1.bf16.msra.mxu0 %v3110_v40  ;;  %v3245_v40 = vld [vmem:[#allocation6] ss:$8 sps:$4 sm:$0xff]  }
  0xba   :  { %1870 = vmatprep.subr.bf16.mxu0 %v3118_v41  ;;  %v3247_v41 = vld [vmem:[#allocation6 + $0x4] ss:$8 sps:$4 sm:$0xff]  }
  0xbb   :  { %1752 = vmatpush1.bf16.msra.mxu1 %v3029_v25  ;;  %v3121_v25 = vld [vmem:[#allocation4 + $0x26c] ss:$16 sps:$4 sm:$0xff]  }
  0xbc   :  { %1753 = vmatprep.subr.bf16.mxu1 %v3037_v27  ;;  %v3184_v27 = vld [vmem:[#allocation4 + $0x5ac] ss:$16 sps:$4 sm:$0xff]  }
  0xbd   :  { %1871 = vmatpush1.bf16.msra.mxu0 %v3116_v43  ;;  %v3151_v43 = vld [vmem:[#allocation4 + $0x30c] ss:$16 sps:$4 sm:$0xff]  }
  0xbe   :  { %1872 = vmatprep.subr.bf16.mxu0 %v3124_v44  ;;  %v3248_v44 = vld [vmem:[#allocation6 + $0x10] ss:$8 sps:$4 sm:$0xff]  }
  0xbf   :  { %1754 = vmatpush1.bf16.msra.mxu1 %v3035_v30  ;;  %v3127_v30 = vld [vmem:[#allocation4 + $0x28c] ss:$16 sps:$4 sm:$0xff]  }
  0xc0   :  { %1755 = vmatprep.subr.bf16.mxu1 %v3043_v31  ;;  %v3190_v31 = vld [vmem:[#allocation4 + $0x5cc] ss:$16 sps:$4 sm:$0xff]  }
  0xc1   :  { %1873 = vmatpush1.bf16.msra.mxu0 %v3122_v46  ;;  %v3157_v46 = vld [vmem:[#allocation4 + $0x32c] ss:$16 sps:$4 sm:$0xff]  }
  0xc2   :  { %1874 = vmatprep.subr.bf16.mxu0 %v3130_v47  ;;  %v3251_v47 = vld [vmem:[#allocation6 + $0x20] ss:$8 sps:$4 sm:$0xff]  }
  0xc3   :  { %1756 = vmatpush1.bf16.msra.mxu1 %v3041_v34  ;;  %v3196_v34 = vld [vmem:[#allocation4 + $0x5ec] ss:$16 sps:$4 sm:$0xff]  }
  0xc4   :  { %1757 = vmatprep.subr.bf16.mxu1 %v3049_v35  ;;  %v3131_v35 = vld [vmem:[#allocation4 + $0x2a8] ss:$16 sps:$4 sm:$0xff]  }
  0xc5   :  { %1875 = vmatpush1.bf16.msra.mxu0 %v3128_v4  ;;  %v3254_v4 = vld [vmem:[#allocation6 + $0x30] ss:$8 sps:$4 sm:$0xff]  }
  0xc6   :  { %1876 = vmatprep.subr.bf16.mxu0 %v3136_v50  ;;  %v3259_v50 = vld [vmem:[#allocation6 + $0x44] ss:$8 sps:$4 sm:$0xff]  }
  0xc7   :  { %1758 = vmatpush1.bf16.msra.mxu1 %v3047_v38  ;;  %v3137_v38 = vld [vmem:[#allocation4 + $0x2c8] ss:$16 sps:$4 sm:$0xff]  }
  0xc8   :  { %1759 = vmatprep.subr.bf16.mxu1 %v3055_v39  ;;  %v3145_v39 = vld [vmem:[#allocation4 + $0x2ec] ss:$16 sps:$4 sm:$0xff]  }
  0xc9   :  { %1877 = vmatpush1.bf16.msra.mxu0 %v3134_v53  ;;  %v3257_v53 = vld [vmem:[#allocation6 + $0x40] ss:$8 sps:$4 sm:$0xff]  }
  0xca   :  { %1878 = vmatprep.subr.bf16.mxu0 %v3142_v54  ;;  %v3262_v54 = vld [vmem:[#allocation6 + $0x54] ss:$8 sps:$4 sm:$0xff]  }
  0xcb   :  { %1760 = vmatpush1.bf16.msra.mxu1 %v3053_v42  ;;  %v3250_v42 = vld [vmem:[#allocation6 + $0x14] ss:$8 sps:$4 sm:$0xff]  }
  0xcc   :  { %1761 = vmatprep.subr.bf16.mxu1 %v3061_v16  ;;  %v3143_v16 = vld [vmem:[#allocation4 + $0x2e8] ss:$16 sps:$4 sm:$0xff]  }
  0xcd   :  { %1879 = vmatpush1.bf16.msra.mxu0 %v3140_v57  ;;  %v3260_v57 = vld [vmem:[#allocation6 + $0x50] ss:$8 sps:$4 sm:$0xff]  }
  0xce   :  { %1880 = vmatprep.subr.bf16.mxu0 %v3148_v59  ;;  %v3265_v59 = vld [vmem:[#allocation6 + $0x64] ss:$8 sps:$4 sm:$0xff]  }
  0xcf   :  { %1762 = vmatpush1.bf16.msra.mxu1 %v3059_v45  ;;  %v3253_v45 = vld [vmem:[#allocation6 + $0x24] ss:$8 sps:$4 sm:$0xff]  }
  0xd0   :  { %1763 = vmatprep.subr.bf16.mxu1 %v3067_v58  ;;  %v3149_v58 = vld [vmem:[#allocation4 + $0x308] ss:$16 sps:$4 sm:$0xff]  }
  0xd1   :  { %1881 = vmatpush1.bf16.msra.mxu0 %v3146_v62  ;;  %v3263_v62 = vld [vmem:[#allocation6 + $0x60] ss:$8 sps:$4 sm:$0xff]  }
  0xd2   :  { %1882 = vmatprep.subr.bf16.mxu0 %v3154_v63  ;;  %v3268_v63 = vld [vmem:[#allocation6 + $0x74] ss:$8 sps:$4 sm:$0xff]  }
  0xd3   :  { %1764 = vmatpush1.bf16.msra.mxu1 %v3065_v48  ;;  %v3256_v48 = vld [vmem:[#allocation6 + $0x34] ss:$8 sps:$4 sm:$0xff]  }
  0xd4   :  { %1765 = vmatprep.subr.bf16.mxu1 %v3073_v49  ;;  %v3163_v49 = vld [vmem:[#allocation4 + $0x34c] ss:$16 sps:$4 sm:$0xff]  }
  0xd5   :  { %1883 = vmatpush1.bf16.msra.mxu0 %v3152_v3  ;;  %v3266_v3 = vld [vmem:[#allocation6 + $0x70] ss:$8 sps:$4 sm:$0xff]  }
  0xd6   :  { %1884 = vmatprep.subr.bf16.mxu0 %v3160_v6  ;;  %v3271_v6 = vld [vmem:[#allocation6 + $0x84] ss:$8 sps:$4 sm:$0xff]  }
  0xd7   :  { %1766 = vmatpush1.bf16.msra.mxu1 %v3071_v51  ;;  %v3161_v51 = vld [vmem:[#allocation4 + $0x348] ss:$16 sps:$4 sm:$0xff]  }
  0xd8   :  { %1767 = vmatprep.subr.bf16.mxu1 %v3079_v52  ;;  %v3169_v52 = vld [vmem:[#allocation4 + $0x36c] ss:$16 sps:$4 sm:$0xff]  }
  0xd9   :  { %1885 = vmatpush1.bf16.msra.mxu0 %v3158_v10  ;;  %v3274_v10 = vld [vmem:[#allocation6 + $0x94] ss:$8 sps:$4 sm:$0xff]  }
  0xda   :  { %1886 = vmatprep.subr.bf16.mxu0 %v3166_v12  ;;  %v3191_v12 = vld [vmem:[#allocation4 + $0x3e8] ss:$16 sps:$4 sm:$0xff]  }
  0xdb   :  { %1768 = vmatpush1.bf16.msra.mxu1 %v3077_v55  ;;  %v3167_v55 = vld [vmem:[#allocation4 + $0x368] ss:$16 sps:$4 sm:$0xff]  }
  0xdc   :  { %1769 = vmatprep.subr.bf16.mxu1 %v3085_v56  ;;  %v3175_v56 = vld [vmem:[#allocation4 + $0x38c] ss:$16 sps:$4 sm:$0xff]  }
  0xdd   :  { %1887 = vmatpush1.bf16.msra.mxu0 %v3164_v14  ;;  %v3272_v14 = vld [vmem:[#allocation6 + $0x90] ss:$8 sps:$4 sm:$0xff]  }
  0xde   :  { %1888 = vmatprep.subr.bf16.mxu0 %v3172_v18  ;;  %v3197_v18 = vld [vmem:[#allocation4 + $0x608] ss:$16 sps:$4 sm:$0xff]  }
  0xdf   :  { %1770 = vmatpush1.bf16.msra.mxu1 %v3083_v60  ;;  %v3173_v60 = vld [vmem:[#allocation4 + $0x388] ss:$16 sps:$4 sm:$0xff]  }
  0xe0   :  { %1771 = vmatprep.subr.bf16.mxu1 %v3091_v61  ;;  %v3181_v61 = vld [vmem:[#allocation4 + $0x3ac] ss:$16 sps:$4 sm:$0xff]  }
  0xe1   :  { %1889 = vmatpush1.bf16.msra.mxu0 %v3170_v20  ;;  %v3275_v20 = vld [vmem:[#allocation6 + $0xa0] ss:$8 sps:$4 sm:$0xff]  }
  0xe2   :  { %1890 = vmatprep.subr.bf16.mxu0 %v3178_v22  ;;  %v3200_v22 = vld [vmem:[#allocation4 + $0x628] ss:$16 sps:$4 sm:$0xff]  }
  0xe3   :  { %1772 = vmatpush1.bf16.msra.mxu1 %v3089_v1  ;;  %v3179_v1 = vld [vmem:[#allocation4 + $0x3a8] ss:$16 sps:$4 sm:$0xff]  }
  0xe4   :  { %1773 = vmatprep.subr.bf16.mxu1 %v3097_v2  ;;  %v3187_v2 = vld [vmem:[#allocation4 + $0x3cc] ss:$16 sps:$4 sm:$0xff]  }
  0xe5   :  { %1891 = vmatpush1.bf16.msra.mxu0 %v3176_v24  ;;  %v3278_v24 = vld [vmem:[#allocation6 + $0xb0] ss:$8 sps:$4 sm:$0xff]  }
  0xe6   :  { %1892 = vmatprep.subr.bf16.mxu0 %v3184_v27  ;;  %v3203_v27 = vld [vmem:[#allocation4 + $0x648] ss:$16 sps:$4 sm:$0xff]  }
  0xe7   :  { %1774 = vmatpush1.bf16.msra.mxu1 %v3095_v7  ;;  %v3185_v7 = vld [vmem:[#allocation4 + $0x3c8] ss:$16 sps:$4 sm:$0xff]  }
  0xe8   :  { %1825 = vmatprep.subr.bf16.mxu1 %v3103_v9  ;;  %v3269_v9 = vld [vmem:[#allocation6 + $0x80] ss:$8 sps:$4 sm:$0xff]  }
  0xe9   :  { %1893 = vmatpush1.bf16.msra.mxu0 %v3182_v29  ;;  %v3281_v29 = vld [vmem:[#allocation6 + $0xc0] ss:$8 sps:$4 sm:$0xff]  }
  0xea   :  { %1776 = vmatmul.mubr.bf16.vlgmr.msra.gmra.mrb[8].mxu1 %v3514_v15  ;;  %1894 = vmatprep.subr.bf16.mxu0 %v3190_v31  ;;  %v3214_v31 = vld [vmem:[#allocation4 + $0x6ac] ss:$16 sps:$4 sm:$0xff]  }
  0xeb   :  { %1826 = vmatpush1.bf16.msra.mxu1 %v3101_v13  ;;  %1857 = vmatprep.mubr.bf16.mxu1 %v3480_v0  ;;  %v3188_v0 = vld [vmem:[#allocation4 + $0x5c8] ss:$16 sps:$4 sm:$0xff]   ;;  %v3199_v13 = vld [vmem:[#allocation4 + $0x60c] ss:$16 sps:$4 sm:$0xff]  }
  0xec   :  { %1827 = vmatprep.subr.bf16.mxu1 %v3109_v17  ;;  %v3277_v17 = vld [vmem:[#allocation6 + $0xa4] ss:$8 sps:$4 sm:$0xff]  }
  0xed   :  { %1895 = vmatpush1.bf16.msra.mxu0 %v3188_v0  ;;  %v3286_v0 = vld [vmem:[#allocation6 + $0xd4] ss:$8 sps:$4 sm:$0xff]  }
  0xee   :  { %1896 = vmatprep.subr.bf16.mxu0 %v3196_v34  ;;  %v3284_v34 = vld [vmem:[#allocation6 + $0xd0] ss:$8 sps:$4 sm:$0xff]  }
  0xef   :  { %1828 = vmatpush1.bf16.msra.mxu1 %v3107_v19  ;;  %v3202_v19 = vld [vmem:[#allocation4 + $0x62c] ss:$16 sps:$4 sm:$0xff]  }
  0xf0   :  { %1829 = vmatprep.subr.bf16.mxu1 %v3115_v21  ;;  %v3280_v21 = vld [vmem:[#allocation6 + $0xb4] ss:$8 sps:$4 sm:$0xff]  }
  0xf1   :  { %1897 = vmatpush1.bf16.msra.mxu0 %v3194_v36 }
  0xf2   :  { %2401 = vmatprep.subr.bf16.mxu0 %v3247_v41  ;;  %v3220_v41 = vld [vmem:[#allocation4 + $0x6ec] ss:$16 sps:$4 sm:$0xff]  }
  0xf3   :  { %1830 = vmatpush1.bf16.msra.mxu1 %v3113_v23  ;;  %v3205_v23 = vld [vmem:[#allocation4 + $0x64c] ss:$16 sps:$4 sm:$0xff]  }
  0xf4   :  { %1831 = vmatprep.subr.bf16.mxu1 %v3121_v25  ;;  %1899 = vmatmul.mubr.bf16.vlgmr.msra.gmra.mrb[8].mxu0 %v3493_v26  ;;  %v3155_v26 = vld [vmem:[#allocation4 + $0x328] ss:$16 sps:$4 sm:$0xff]   ;;  %v3283_v25 = vld [vmem:[#allocation6 + $0xc4] ss:$8 sps:$4 sm:$0xff]  }
  0xf5   :  { %2402 = vmatpush1.bf16.msra.mxu0 %v3245_v40 }
  0xf6   :  { %2403 = vmatprep.subr.bf16.mxu0 %v3250_v42  ;;  %v3287_v42 = vld [vmem:[#allocation6 + $0xe0] ss:$8 sps:$4 sm:$0xff]  }
  0xf7   :  { %1832 = vmatpush1.bf16.msra.mxu1 %v3119_v28  ;;  %v3208_v28 = vld [vmem:[#allocation4 + $0x66c] ss:$16 sps:$4 sm:$0xff]  }
  0xf8   :  { %1833 = vmatprep.subr.bf16.mxu1 %v3127_v30  ;;  %v3206_v30 = vld [vmem:[#allocation4 + $0x668] ss:$16 sps:$4 sm:$0xff]  }
  0xf9   :  { %2404 = vmatpush1.bf16.msra.mxu0 %v3248_v44  ;;  %v3223_v44 = vld [vmem:[#allocation4 + $0x70c] ss:$16 sps:$4 sm:$0xff]  }
  0xfa   :  { %2405 = vmatprep.subr.bf16.mxu0 %v3253_v45  ;;  %v3290_v45 = vld [vmem:[#allocation6 + $0xf0] ss:$8 sps:$4 sm:$0xff]  }
  0xfb   :  { %1834 = vmatpush1.bf16.msra.mxu1 %v3125_v32  ;;  %v3212_v32 = vld [vmem:[#allocation4 + $0x6a8] ss:$16 sps:$4 sm:$0xff]  }
  0xfc   :  { %1835 = vmatprep.subr.bf16.mxu1 %v3133_v33  ;;  %v3217_v33 = vld [vmem:[#allocation4 + $0x6cc] ss:$16 sps:$4 sm:$0xff]  }
  0xfd   :  { %2406 = vmatpush1.bf16.msra.mxu0 %v3251_v47  ;;  %v3224_v47 = vld [vmem:[#allocation4 + $0x728] ss:$16 sps:$4 sm:$0xff]  }
  0xfe   :  { %2407 = vmatprep.subr.bf16.mxu0 %v3256_v48  ;;  %v3229_v48 = vld [vmem:[#allocation4 + $0x74c] ss:$16 sps:$4 sm:$0xff]  }
  0xff   :  { %1836 = vmatpush1.bf16.msra.mxu1 %v3131_v35 }
 0x100   :  { %1837 = vmatprep.subr.bf16.mxu1 %v3139_v37 }
 0x101   :  { %2408 = vmatpush1.bf16.msra.mxu0 %v3254_v4  ;;  %v3230_v4 = vld [vmem:[#allocation4 + $0x768] ss:$16 sps:$4 sm:$0xff]  }
 0x102   :  { %2409 = vmatprep.subr.bf16.mxu0 %v3259_v50  ;;  %v3235_v50 = vld [vmem:[#allocation4 + $0x78c] ss:$16 sps:$4 sm:$0xff]  }
 0x103   :  { %1838 = vmatpush1.bf16.msra.mxu1 %v3137_v38  ;;  %v3215_v38 = vld [vmem:[#allocation4 + $0x6c8] ss:$16 sps:$4 sm:$0xff]  }
 0x104   :  { %1839 = vmatprep.subr.bf16.mxu1 %v3145_v39  ;;  %v3289_v39 = vld [vmem:[#allocation6 + $0xe4] ss:$8 sps:$4 sm:$0xff]  }
 0x105   :  { %2410 = vmatpush1.bf16.msra.mxu0 %v3257_v53  ;;  %v3233_v53 = vld [vmem:[#allocation4 + $0x788] ss:$16 sps:$4 sm:$0xff]  }
 0x106   :  { %2411 = vmatprep.subr.bf16.mxu0 %v3262_v54 }
 0x107   :  { %1840 = vmatpush1.bf16.msra.mxu1 %v3143_v16  ;;  %v3218_v16 = vld [vmem:[#allocation4 + $0x6e8] ss:$16 sps:$4 sm:$0xff]  }
 0x108   :  { %1841 = vmatprep.subr.bf16.mxu1 %v3151_v43  ;;  %v3292_v43 = vld [vmem:[#allocation6 + $0xf4] ss:$8 sps:$4 sm:$0xff]  }
 0x109   :  { %2412 = vmatpush1.bf16.msra.mxu0 %v3260_v57  ;;  %v3236_v57 = vld [vmem:[#allocation4 + $0x7a8] ss:$16 sps:$4 sm:$0xff]  }
 0x10a   :  { %2413 = vmatprep.subr.bf16.mxu0 %v3265_v59  ;;  %v3241_v59 = vld [vmem:[#allocation4 + $0x7cc] ss:$16 sps:$4 sm:$0xff]  }
 0x10b   :  { %1842 = vmatpush1.bf16.msra.mxu1 %v3149_v58  ;;  %v3221_v58 = vld [vmem:[#allocation4 + $0x708] ss:$16 sps:$4 sm:$0xff]  }
 0x10c   :  { %1843 = vmatprep.subr.bf16.mxu1 %v3157_v46  ;;  %v3226_v46 = vld [vmem:[#allocation4 + $0x72c] ss:$16 sps:$4 sm:$0xff]  }
 0x10d   :  { %2414 = vmatpush1.bf16.msra.mxu0 %v3263_v62  ;;  %v3242_v62 = vld [vmem:[#allocation4 + $0x7e8] ss:$16 sps:$4 sm:$0xff]  }
 0x10e   :  { %2415 = vmatprep.subr.bf16.mxu0 %v3268_v63 }
 0x10f   :  { %1844 = vmatpush1.bf16.msra.mxu1 %v3155_v26  ;;  %v3227_v26 = vld [vmem:[#allocation4 + $0x748] ss:$16 sps:$4 sm:$0xff]  }
 0x110   :  { %1845 = vmatprep.subr.bf16.mxu1 %v3163_v49  ;;  %v3232_v49 = vld [vmem:[#allocation4 + $0x76c] ss:$16 sps:$4 sm:$0xff]  }
 0x111   :  { %2416 = vmatpush1.bf16.msra.mxu0 %v3266_v3 }
 0x112   :  { %2417 = vmatprep.subr.bf16.mxu0 %v3271_v6 }
 0x113   :  { %1846 = vmatpush1.bf16.msra.mxu1 %v3161_v51 }
 0x114   :  { %1847 = vmatprep.subr.bf16.mxu1 %v3169_v52 }
 0x115   :  { %2418 = vmatpush1.bf16.msra.mxu0 %v3269_v9 }
 0x116   :  { %2419 = vmatprep.subr.bf16.mxu0 %v3274_v10  ;;  %v3295_v10 = vld [vmem:[#allocation6 + $0x104] ss:$8 sps:$4 sm:$0xff]  }
 0x117   :  { %1848 = vmatpush1.bf16.msra.mxu1 %v3167_v55  ;;  %v3238_v55 = vld [vmem:[#allocation4 + $0x7ac] ss:$16 sps:$4 sm:$0xff]  }
 0x118   :  { %1849 = vmatprep.subr.bf16.mxu1 %v3175_v56 }
 0x119   :  { %2420 = vmatpush1.bf16.msra.mxu0 %v3272_v14 }
 0x11a   :  { %2421 = vmatprep.subr.bf16.mxu0 %v3277_v17 }
 0x11b   :  { %1850 = vmatpush1.bf16.msra.mxu1 %v3173_v60  ;;  %v3239_v60 = vld [vmem:[#allocation4 + $0x7c8] ss:$16 sps:$4 sm:$0xff]  }
 0x11c   :  { %1851 = vmatprep.subr.bf16.mxu1 %v3181_v61  ;;  %v3244_v61 = vld [vmem:[#allocation4 + $0x7ec] ss:$16 sps:$4 sm:$0xff]  }
 0x11d   :  { %2422 = vmatpush1.bf16.msra.mxu0 %v3275_v20  ;;  %v3534_v20 = vld [vmem:[%s3564_s2] sm:$0xf] }
 0x11e   :  { %2423 = vmatprep.subr.bf16.mxu0 %v3280_v21 }
 0x11f   :  { %1852 = vmatpush1.bf16.msra.mxu1 %v3179_v1 }
 0x120   :  { %1853 = vmatprep.subr.bf16.mxu1 %v3187_v2 }
 0x121   :  { %2424 = vmatpush1.bf16.msra.mxu0 %v3278_v24 }
 0x122   :  { %2425 = vmatprep.subr.bf16.mxu0 %v3283_v25 }
 0x123   :  { %1854 = vmatpush1.bf16.msra.mxu1 %v3185_v7 }
 0x124   :  { %1855 = vmatprep.subr.bf16.mxu1 %v3193_v8 }
 0x125   :  { %2426 = vmatpush1.bf16.msra.mxu0 %v3281_v29 }
 0x126   :  { %2427 = vmatprep.subr.bf16.mxu0 %v3286_v0 }
 0x127   :  { %1856 = vmatpush1.bf16.msra.mxu1 %v3191_v12 }
 0x128   :  { %1907 = vmatprep.subr.bf16.mxu1 %v3199_v13 }
 0x129   :  { %2428 = vmatpush1.bf16.msra.mxu0 %v3284_v34 }
 0x12a   :  { %1858 = vmatmul.mubr.bf16.vlgmr.msra.gmra.mrb[12].mxu1 %v3500_v5  ;;  %v3211_v5 = vld [vmem:[#allocation4 + $0x68c] ss:$16 sps:$4 sm:$0xff]   ;;  %2429 = vmatprep.subr.bf16.mxu0 %v3289_v39 }
 0x12b   :  { %1908 = vmatpush1.bf16.msra.mxu1 %v3197_v18  ;;  %1939 = vmatprep.mubr.bf16.mxu1 %v3505_v11  ;;  %v3209_v11 = vld [vmem:[#allocation4 + $0x688] ss:$16 sps:$4 sm:$0xff]   ;;  %v1965_v18 = vlaneseq  ;;  %v3301_v39 = vld [vmem:[#allocation6 + $0x124] ss:$8 sps:$4 sm:$0xff]  }
 0x12c   :  { %1909 = vmatprep.subr.bf16.mxu1 %v3202_v19 }
 0x12d   :  { %2430 = vmatpush1.bf16.msra.mxu0 %v3287_v42  ;;  %v3526_v19 = vshrl.u32 %v1965_v18, 7  ;;  %v3302_v42 = vld [vmem:[#allocation6 + $0x130] ss:$8 sps:$4 sm:$0xff]  }
 0x12e   :  { %2431 = vmatprep.subr.bf16.mxu0 %v3292_v43 }
 0x12f   :  { %1910 = vmatpush1.bf16.msra.mxu1 %v3200_v22  ;;  %v3537_v21 = vsub.s32 1, %v3526_v19 }
 0x130   :  { %1911 = vmatprep.subr.bf16.mxu1 %v3205_v23 }
 0x131   :  { %2432 = vmatpush1.bf16.msra.mxu0 %v3290_v45  ;;  %v1972_v24 = vrot.slane %v3534_v20, %v3537_v21  ;;  %v3305_v45 = vld [vmem:[#allocation6 + $0x140] ss:$8 sps:$4 sm:$0xff]  }
 0x132   :  { %2442 = vmatprep.subr.bf16.mxu0 %v3295_v10  ;;  %v3340_v10 = vld [vmem:[#allocation6 + $0x1f4] ss:$8 sps:$4 sm:$0xff]  }
 0x133   :  { %1912 = vmatpush1.bf16.msra.mxu1 %v3203_v27 }
 0x134   :  { %1913 = vmatprep.subr.bf16.mxu1 %v3208_v28 }
 0x137   :  { %1914 = vmatpush1.bf16.msra.mxu1 %v3206_v30 }
 0x138   :  { %1915 = vmatprep.subr.bf16.mxu1 %v3211_v5 }
 0x13b   :  { %1916 = vmatpush1.bf16.msra.mxu1 %v3209_v11 }
 0x13c   :  { %1917 = vmatprep.subr.bf16.mxu1 %v3214_v31 }
 0x13d   :  { %v1654_v35 = vpop.f32.mrb[0].mxu1 }
 0x13e   :  { %v1656_v36 = vpop.f32.mrb[1].mxu1 }
 0x13f   :  { %v1658_v37 = vpop.f32.mrb[2].mxu1  ;;  %1918 = vmatpush1.bf16.msra.mxu1 %v3212_v32 }
 0x140   :  { %v1659_v40 = vpop.f32.mrb[3].mxu1  ;;  %1919 = vmatprep.subr.bf16.mxu1 %v3217_v33  ;;  %v3298_v37 = vld [vmem:[#allocation6 + $0x114] ss:$8 sps:$4 sm:$0xff]  }
 0x141   :  { %v3299_v40 = vld [vmem:[#allocation6 + $0x120] ss:$8 sps:$4 sm:$0xff]  }
 0x143   :  { %1920 = vmatpush1.bf16.msra.mxu1 %v3215_v38  ;;  %v3296_v38 = vld [vmem:[#allocation6 + $0x110] ss:$8 sps:$4 sm:$0xff]  }
 0x144   :  { %1921 = vmatprep.subr.bf16.mxu1 %v3220_v41  ;;  %v3304_v41 = vld [vmem:[#allocation6 + $0x134] ss:$8 sps:$4 sm:$0xff]  }
 0x147   :  { %1922 = vmatpush1.bf16.msra.mxu1 %v3218_v16  ;;  %v1736_v51 = vpop.f32.mrb[0].mxu0  ;;  %v3307_v16 = vld [vmem:[#allocation6 + $0x144] ss:$8 sps:$4 sm:$0xff]  }
 0x148   :  { %1923 = vmatprep.subr.bf16.mxu1 %v3223_v44  ;;  %v1738_v52 = vpop.f32.mrb[1].mxu0 }
 0x149   :  { %v1740_v54 = vpop.f32.mrb[2].mxu0 }
 0x14a   :  { %v1741_v56 = vpop.f32.mrb[3].mxu0  ;;  %v3320_v54 = vld [vmem:[#allocation6 + $0x190] ss:$8 sps:$4 sm:$0xff]  }
 0x14b   :  { %1924 = vmatpush1.bf16.msra.mxu1 %v3221_v58  ;;  %v3310_v58 = vld [vmem:[#allocation6 + $0x154] ss:$8 sps:$4 sm:$0xff]   ;;  %v3323_v56 = vld [vmem:[#allocation6 + $0x1a0] ss:$8 sps:$4 sm:$0xff]  }
 0x14c   :  { %1925 = vmatprep.subr.bf16.mxu1 %v3226_v46 }
 0x14f   :  { %1926 = vmatpush1.bf16.msra.mxu1 %v3224_v47 }
 0x150   :  { %1927 = vmatprep.subr.bf16.mxu1 %v3229_v48  ;;  %v3308_v48 = vld [vmem:[#allocation6 + $0x150] ss:$8 sps:$4 sm:$0xff]  }
 0x153   :  { %1928 = vmatpush1.bf16.msra.mxu1 %v3227_v26  ;;  %v3313_v26 = vld [vmem:[#allocation6 + $0x164] ss:$8 sps:$4 sm:$0xff]  }
 0x154   :  { %1929 = vmatprep.subr.bf16.mxu1 %v3232_v49  ;;  %v3311_v49 = vld [vmem:[#allocation6 + $0x160] ss:$8 sps:$4 sm:$0xff]  }
 0x157   :  { %1930 = vmatpush1.bf16.msra.mxu1 %v3230_v4  ;;  %v3316_v4 = vld [vmem:[#allocation6 + $0x174] ss:$8 sps:$4 sm:$0xff]  }
 0x158   :  { %1931 = vmatprep.subr.bf16.mxu1 %v3235_v50  ;;  %v3314_v50 = vld [vmem:[#allocation6 + $0x170] ss:$8 sps:$4 sm:$0xff]  }
 0x15b   :  { %1932 = vmatpush1.bf16.msra.mxu1 %v3233_v53  ;;  %v3322_v53 = vld [vmem:[#allocation6 + $0x194] ss:$8 sps:$4 sm:$0xff]  }
 0x15c   :  { %1933 = vmatprep.subr.bf16.mxu1 %v3238_v55  ;;  %v3325_v55 = vld [vmem:[#allocation6 + $0x1a4] ss:$8 sps:$4 sm:$0xff]  }
 0x15f   :  { %1934 = vmatpush1.bf16.msra.mxu1 %v3236_v57  ;;  %v3328_v57 = vld [vmem:[#allocation6 + $0x1b4] ss:$8 sps:$4 sm:$0xff]  }
 0x160   :  { %1935 = vmatprep.subr.bf16.mxu1 %v3241_v59  ;;  %v3326_v59 = vld [vmem:[#allocation6 + $0x1b0] ss:$8 sps:$4 sm:$0xff]  }
 0x163   :  { %1936 = vmatpush1.bf16.msra.mxu1 %v3239_v60  ;;  %v3331_v60 = vld [vmem:[#allocation6 + $0x1c4] ss:$8 sps:$4 sm:$0xff]  }
 0x164   :  { %1937 = vmatprep.subr.bf16.mxu1 %v3244_v61  ;;  %v3329_v61 = vld [vmem:[#allocation6 + $0x1c0] ss:$8 sps:$4 sm:$0xff]  }
 0x167   :  { %1938 = vmatpush1.bf16.msra.mxu1 %v3242_v62  ;;  %v3334_v62 = vld [vmem:[#allocation6 + $0x1d4] ss:$8 sps:$4 sm:$0xff]  }
 0x16a   :  { %1940 = vmatmul.mubr.bf16.vlgmr.msra.gmra.mrb[16].mxu1 %v3514_v15  ;;  %v3529_v15 = vsub.s32 0, %v3526_v19 }
 0x16c   :  { %v1968_v22 = vrot.slane %v3534_v20, %v3529_v15 }
 0x17d   :  { %v1695_v63 = vpop.f32.mrb[4].mxu1 }
 0x17e   :  { %v1696_v1 = vadd.f32 %v1695_v63, %v1654_v35  ;;  %v1697_v2 = vpop.f32.mrb[5].mxu1  ;;  %v3293_v35 = vld [vmem:[#allocation6 + $0x100] ss:$8 sps:$4 sm:$0xff]   ;;  %v3332_v63 = vld [vmem:[#allocation6 + $0x1d0] ss:$8 sps:$4 sm:$0xff]  }
 0x17f   :  { %v1698_v3 = vadd.f32 %v1697_v2, %v1656_v36  ;;  %v1699_v6 = vpop.f32.mrb[6].mxu1 }
 0x180   :  { %v1737_v7 = vadd.f32 %v1736_v51, %v1696_v1  ;;  %v1700_v8 = vpop.f32.mrb[7].mxu1  ;;  %v3319_v51 = vld [vmem:[#allocation6 + $0x184] ss:$8 sps:$4 sm:$0xff]  }
 0x181   :  { %v1739_v9 = vadd.f32 %v1738_v52, %v1698_v3  ;;  %v3317_v52 = vld [vmem:[#allocation6 + $0x180] ss:$8 sps:$4 sm:$0xff]   ;;  %v3337_v1 = vld [vmem:[#allocation6 + $0x1e4] ss:$8 sps:$4 sm:$0xff]  }
 0x187   :  { %v3522_v12 = vpop.f32.mrb[4].mxu0 }
 0x188   :  { %v3524_v13 = vpop.f32.mrb[5].mxu0 }
 0x189   :  { %v1822_v14 = vpop.f32.mrb[6].mxu0 }
 0x18a   :  { %v1823_v17 = vpop.f32.mrb[7].mxu0 }
 0x1bd   :  { %v1777_v23 = vpop.f32.mrb[8].mxu1 }
 0x1be   :  { %v1778_v25 = vadd.f32 %v1777_v23, %v1737_v7  ;;  %v1779_v27 = vpop.f32.mrb[9].mxu1  ;;  %v3335_v7 = vld [vmem:[#allocation6 + $0x1e0] ss:$8 sps:$4 sm:$0xff]   ;;  %v1975_v23 = vsub.s32 2, %v3526_v19 }
 0x1bf   :  { %v1780_v28 = vadd.f32 %v1779_v27, %v1739_v9  ;;  %v1781_v29 = vpop.f32.mrb[10].mxu1 }
 0x1c0   :  { %v1985_v30 = vadd.f32 %v1968_v22, %v1778_v25  ;;  %v1782_v5 = vpop.f32.mrb[11].mxu1  ;;  %v3338_v22 = vld [vmem:[#allocation6 + $0x1f0] ss:$8 sps:$4 sm:$0xff]  }
 0x1c1   :  { %v1986_v11 = vadd.f32 %v1972_v24, %v1780_v28  ;;  %v1979_v24 = vsub.s32 3, %v3526_v19 }
 0x1c2   :  { %vm1989_vm0 = vcmp.gt.f32.partialorder %v1985_v30, 0.0  ;;  %v1993_v31 = vmul.f32 0.2, %v1985_v30 }
 0x1c3   :  { %v1994_v32 = vmul.f32 0.2, %v1986_v11  ;;  %vm1990_vm1 = vcmp.gt.f32.partialorder %v1986_v11, 0.0  ;;  %v1980_v27 = vrot.slane %v3534_v20, %v1979_v24 }
 0x1c4   :  { %v1997_v0 = vsel %vm1989_vm0, %v1985_v30, %v1993_v31 }
 0x1c5   :  { %v1998_v33 = vsel %vm1990_vm1, %v1986_v11, %v1994_v32  ;;  %v2001_v36 = vpack.c.bf16 %v1997_v0, %v1997_v0 }
 0x1c6   :  { %v2002_v34 = vpack.c.bf16 %v1998_v33, %v1998_v33 }
 0x1c7   :  { %v1900_v43 = vpop.f32.mrb[8].mxu0 }
 0x1c8   :  { %2433 = vmatprep.mubr.bf16.mxu0 %v2002_v34  ;;  %v1902_v44 = vpop.f32.mrb[9].mxu0 }
 0x1c9   :  { %2434 = vmatmul.mubr.bf16.vlgmr.msra.gmra.mrb[12].mxu0 %v2001_v36  ;;  %v1904_v46 = vpop.f32.mrb[10].mxu0 }
 0x1ca   :  { %2443 = vmatpush1.bf16.msra.mxu0 %v3293_v35  ;;  %v1905_v47 = vpop.f32.mrb[11].mxu0 }
 0x1cb   :  { %2444 = vmatprep.subr.bf16.mxu0 %v3298_v37 }
 0x1ce   :  { %2445 = vmatpush1.bf16.msra.mxu0 %v3296_v38  ;;  %v2489_v38 = vld [vmem:[%s3567_s5] sm:$0x3] }
 0x1cf   :  { %2446 = vmatprep.subr.bf16.mxu0 %v3301_v39 }
 0x1d2   :  { %2447 = vmatpush1.bf16.msra.mxu0 %v3299_v40 }
 0x1d3   :  { %2448 = vmatprep.subr.bf16.mxu0 %v3304_v41 }
 0x1d6   :  { %2449 = vmatpush1.bf16.msra.mxu0 %v3302_v42 }
 0x1d7   :  { %2450 = vmatprep.subr.bf16.mxu0 %v3307_v16 }
 0x1da   :  { %2451 = vmatpush1.bf16.msra.mxu0 %v3305_v45 }
 0x1db   :  { %2452 = vmatprep.subr.bf16.mxu0 %v3310_v58  ;;  %v2498_v58 = vrot.slane %v2489_v38, %v3537_v21 }
 0x1de   :  { %2453 = vmatpush1.bf16.msra.mxu0 %v3308_v48 }
 0x1df   :  { %2454 = vmatprep.subr.bf16.mxu0 %v3313_v26 }
 0x1e2   :  { %2455 = vmatpush1.bf16.msra.mxu0 %v3311_v49 }
 0x1e3   :  { %2456 = vmatprep.subr.bf16.mxu0 %v3316_v4 }
 0x1e6   :  { %2457 = vmatpush1.bf16.msra.mxu0 %v3314_v50  ;;  %v2848_v50 = vld [vmem:[#allocation3] ss:$0 sm:$0xff] }
 0x1e7   :  { %2458 = vmatprep.subr.bf16.mxu0 %v3319_v51 }
 0x1ea   :  { %2459 = vmatpush1.bf16.msra.mxu0 %v3317_v52 }
 0x1eb   :  { %2460 = vmatprep.subr.bf16.mxu0 %v3322_v53 }
 0x1ee   :  { %2461 = vmatpush1.bf16.msra.mxu0 %v3320_v54 }
 0x1ef   :  { %2462 = vmatprep.subr.bf16.mxu0 %v3325_v55 }
 0x1f2   :  { %2463 = vmatpush1.bf16.msra.mxu0 %v3323_v56 }
 0x1f3   :  { %2464 = vmatprep.subr.bf16.mxu0 %v3328_v57 }
 0x1f6   :  { %2465 = vmatpush1.bf16.msra.mxu0 %v3326_v59 }
 0x1f7   :  { %2466 = vmatprep.subr.bf16.mxu0 %v3331_v60 }
 0x1fa   :  { %2467 = vmatpush1.bf16.msra.mxu0 %v3329_v61 }
 0x1fb   :  { %2468 = vmatprep.subr.bf16.mxu0 %v3334_v62 }
 0x1fd   :  { %v1859_v2 = vpop.f32.mrb[12].mxu1 }
 0x1fe   :  { %v1860_v3 = vadd.f32 %v1859_v2, %v3522_v12  ;;  %v1861_v6 = vpop.f32.mrb[13].mxu1  ;;  %2469 = vmatpush1.bf16.msra.mxu0 %v3332_v63  ;;  %v1976_v12 = vrot.slane %v3534_v20, %v1975_v23  ;;  %v2069_v20 = vld [vmem:[%s3566_s4] sm:$0x3] }
 0x1ff   :  { %v1862_v8 = vadd.f32 %v1861_v6, %v3524_v13  ;;  %v1863_v9 = vpop.f32.mrb[14].mxu1  ;;  %2470 = vmatprep.subr.bf16.mxu0 %v3337_v1  ;;  %v2074_v36 = vrot.slane %v2069_v20, %v3529_v15  ;;  %v2078_v37 = vrot.slane %v2069_v20, %v3537_v21 }
 0x200   :  { %v1901_v14 = vadd.f32 %v1900_v43, %v1860_v3  ;;  %v1864_v17 = vpop.f32.mrb[15].mxu1  ;;  %v2494_v43 = vrot.slane %v2489_v38, %v3529_v15 }
 0x201   :  { %v1903_v18 = vadd.f32 %v1902_v44, %v1862_v8 }
 0x202   :  { %2471 = vmatpush1.bf16.msra.mxu0 %v3335_v7 }
 0x203   :  { %2472 = vmatprep.subr.bf16.mxu0 %v3340_v10 }
 0x206   :  { %2473 = vmatpush1.bf16.msra.mxu0 %v3338_v22 }
 0x23d   :  { %v1941_v25 = vpop.f32.mrb[16].mxu1 }
 0x23e   :  { %v1942_v13 = vadd.f32 %v1941_v25, %v1901_v14  ;;  %v1943_v28 = vpop.f32.mrb[17].mxu1 }
 0x23f   :  { %v1944_v29 = vadd.f32 %v1943_v28, %v1903_v18  ;;  %v1945_v30 = vpop.f32.mrb[18].mxu1 }
 0x240   :  { %v1987_v5 = vadd.f32 %v1976_v12, %v1942_v13  ;;  %v1946_v11 = vpop.f32.mrb[19].mxu1 }
 0x241   :  { %v1988_v31 = vadd.f32 %v1980_v27, %v1944_v29 }
 0x242   :  { %vm1991_vm2 = vcmp.gt.f32.partialorder %v1987_v5, 0.0  ;;  %v1995_v32 = vmul.f32 0.2, %v1987_v5 }
 0x243   :  { %v1996_v0 = vmul.f32 0.2, %v1988_v31  ;;  %vm1992_vm3 = vcmp.gt.f32.partialorder %v1988_v31, 0.0 }
 0x244   :  { %v1999_v33 = vsel %vm1991_vm2, %v1987_v5, %v1995_v32 }
 0x245   :  { %v2000_v34 = vsel %vm1992_vm3, %v1988_v31, %v1996_v0  ;;  %v2003_v19 = vpack.c.bf16 %v1999_v33, %v1999_v33 }
 0x246   :  { %v2004_v35 = vpack.c.bf16 %v2000_v34, %v2000_v34 }
 0x248   :  { %2474 = vmatprep.mubr.bf16.mxu0 %v2004_v35 }
 0x249   :  { %2475 = vmatmul.mubr.bf16.vlgmr.msra.gmra.mrb[12].mxu0 %v2003_v19 }
 0x31c   :  { %v2476_v39 = vpop.f32.mrb[12].mxu0 }
 0x31d   :  { %v2849_v40 = vadd.f32 %v2476_v39, %v2074_v36  ;;  %v2478_v41 = vpop.f32.mrb[13].mxu0 }
 0x31e   :  { %v2850_v42 = vadd.f32 %v2478_v41, %v2078_v37  ;;  %v2480_v16 = vpop.f32.mrb[14].mxu0 }
 0x31f   :  { %vm2483_vm4 = vcmp.gt.f32.partialorder %v2849_v40, 0.0  ;;  %v2485_v44 = vmul.f32 0.2, %v2849_v40  ;;  %v2481_v45 = vpop.f32.mrb[15].mxu0 }
 0x320   :  { %vm2484_vm5 = vcmp.gt.f32.partialorder %v2850_v42, 0.0  ;;  %v2486_v46 = vmul.f32 0.2, %v2850_v42 }
 0x321   :  { %v2487_v47 = vsel %vm2483_vm4, %v2849_v40, %v2485_v44 }
 0x322   :  { %v2488_v48 = vsel %vm2484_vm5, %v2850_v42, %v2486_v46  ;;  %v2501_v26 = vmul.f32 %v2494_v43, %v2487_v47 }
 0x323   :  { %v2502_v49 = vmul.f32 %v2498_v58, %v2488_v48 }
 0x325   :  { %v2503_v4 = vadd.f32 %v2502_v49, %v2501_v26 }
 0x327   :  { %2504 = vadd.xlane.f32.xlu0 %v2503_v4 }
 0x3b4   :  { %v2505_v51 = vpop.xlane.xlu0 %2504 }
 0x3b5   :  { %v2513_v52 = vadd.f32 %v2848_v50, %v2505_v51 }
 0x3b7   :  { %v2514_v53 = vsub.f32 0.0, %v2513_v52 }
 0x3b9   :  { %v2515_v54 = vmul.f32 1.442695, %v2514_v53 }
 0x3bb   :  { %3341 = vpow2.f32 %v2515_v54 }
 0x3c5   :  { %v3342_v15 = vpop.eup %3341 }
 0x3c6   :  { %v2517_v55 = vadd.f32 1.0, %v3342_v15 }
 0x3c8   :  { %3343 = vrcp.f32 %v2517_v55 }
 0x3d2   :  { %v3344_v56 = vpop.eup %3343 }
 0x3d3   :  { %2521 = vst.msk [vmem:[%s3569_s7] sm:$0xff] %vm2520_vm6, %v3344_v56 }
 0x3d4   :  { %2526 = vsyncpa [#allocation5], 1 }
 0x3d5   :  { %2527 = vsyncpa [#allocation7], 1 }

</bundles_post_ra>
